<compile_context>
chip_gen: v7x
topology: tpu7x:2x2x1
jax: 0.10.0
libtpu: 0.0.40
codegen_flags: <defaults>
</compile_context>

<pallas_src>
import functools

import jax
import jax.numpy as jnp
from jax.experimental import pallas as pl
from jax.experimental.pallas import tpu as pltpu


# ----------------------------------------------------------------------------
# Host-side (trace-time) parameter folding / weight lowering
# ----------------------------------------------------------------------------
def _fold_conv_bn(w_oihw, gamma, beta, mean, var, eps=1e-5):
    """Fold eval-mode BN into the conv weight; return (HWIO weight f32, shift)."""
    inv_std = jax.lax.rsqrt(var + eps)
    scale = gamma * inv_std                              # (Cout,)
    shift = beta - mean * scale                          # (Cout,)
    w_hwio = jnp.transpose(w_oihw, (2, 3, 1, 0)) * scale[None, None, None, :]
    return w_hwio, shift


def _lower_taps(w_hwio, W, padding, dilation, rep_out=1):
    """Per-row-tap lowered conv matrices in the channel-major lane layout.

    Input lanes:  ci*W + win   (value x[h, ci, win])
    Output lanes: co*W + w
    R_kh[ci*W+win, co*W+w] = sum_kw W[kh,kw,ci,co] * [win == w + kw*dil - pad]
    (out-of-range taps are dropped == implicit zero padding along W).
    If rep_out > 1 (requires Cout == 1) the output columns are replicated over
    rep_out channel blocks (used to bake the gate's channel broadcast in).
    Returns (KH, Cin*W, rep_out*Cout*W) bf16.
    """
    KH, KW, Cin, Cout = w_hwio.shape
    if rep_out > 1:
        assert Cout == 1
    win = jnp.arange(W)
    wo = jnp.arange(W)
    taps = []
    for kh in range(KH):
        r = jnp.zeros((Cin, W, Cout, W), jnp.float32)
        for kw in range(KW):
            delta = kw * dilation - padding
            m = (win[:, None] == wo[None, :] + delta).astype(jnp.float32)   # (win, w)
            r = r + w_hwio[kh, kw].astype(jnp.float32)[:, None, :, None] * m[None, :, None, :]
        r2 = r.reshape(Cin * W, Cout * W)
        if rep_out > 1:
            r2 = jnp.tile(r2, (1, rep_out))               # columns: c*W + w
        taps.append(r2)
    return jnp.stack(taps).astype(jnp.bfloat16)


def _shift_row(shift, W, rep_out=1):
    """BN shift as a (1, Cout*W*rep_out) f32 lane row (lane = c*W + w)."""
    row = jnp.repeat(shift.astype(jnp.float32), W)
    if rep_out > 1:
        row = jnp.tile(row, rep_out)
    return row.reshape(1, -1)


# ----------------------------------------------------------------------------
# Fused DSAM_Add1 kernel (one image per grid step)
# ----------------------------------------------------------------------------
def _dsam_kernel(x_ref,
                 ri_ref, si_ref,
                 r1_ref, s1_ref, r2_ref, s2_ref, r3_ref, s3_ref, r4_ref, s4_ref,
                 rf_ref, sf_ref, rs_ref, ss_ref,
                 o_ref,
                 p1_buf, p2_buf, p3_buf, p4_buf, cp_buf,
                 *, H, W, C):
    f32 = jnp.float32
    bf16 = jnp.bfloat16
    CW = C * W

    def conv1x1(lhs_bf16, r_ref, s_ref):
        y = jnp.dot(lhs_bf16, r_ref[...], preferred_element_type=f32) + s_ref[...]
        return jnp.maximum(y, 0.0)

    def dilated3(x_f32, pbuf, r_ref, s_ref, d):
        """3x3 dilated conv (padding == dilation == d) + BN shift + ReLU."""
        # H halo (W padding is folded into the lowered matrices).
        pbuf[0:d, :] = jnp.zeros((d, CW), f32)
        pbuf[d:d + H, :] = x_f32
        pbuf[d + H:d + H + d, :] = jnp.zeros((d, CW), f32)
        acc = jnp.zeros((H, CW), f32)
        for kh in range(3):                                # KH accumulated matmuls
            lhs = pbuf[kh * d:kh * d + H, :].astype(bf16)
            acc = acc + jnp.dot(lhs, r_ref[kh], preferred_element_type=f32)
        return jnp.maximum(acc + s_ref[...], 0.0)

    # convInit: 1x1, 2C -> C, BN + ReLU  (x_ref is already bf16)
    x0 = conv1x1(x_ref[0], ri_ref, si_ref)                 # (H, CW) f32

    d1 = dilated3(x0, p1_buf, r1_ref, s1_ref, 1)
    d2 = dilated3(d1, p2_buf, r2_ref, s2_ref, 2)
    d3 = dilated3(d2, p3_buf, r3_ref, s3_ref, 4)
    d4 = dilated3(d3, p4_buf, r4_ref, s4_ref, 8)

    s = d1 + d2 + d3 + d4 + x0                             # residual sum, f32

    # convFinal: 1x1, C -> C, BN + ReLU
    f = conv1x1(s.astype(bf16), rf_ref, sf_ref)            # (H, CW) f32

    # ChannelPool (max / mean over C): channel c occupies lanes [c*W:(c+1)*W].
    mx = f[:, 0:W]
    sm = f[:, 0:W]
    for c in range(1, C):
        blk = f[:, c * W:(c + 1) * W]
        mx = jnp.maximum(mx, blk)
        sm = sm + blk
    mn = sm * (1.0 / C)

    # SpatialGate conv: 7x7, 2 -> 1, padding 3, BN, no ReLU.  The lowered
    # matrix replicates the output over the C channel blocks, so the gate is
    # already lane-dense (H, CW).
    P = 3
    cp_buf[0:P, :] = jnp.zeros((P, 2 * W), f32)
    cp_buf[P:P + H, 0:W] = mx
    cp_buf[P:P + H, W:2 * W] = mn
    cp_buf[P + H:P + H + P, :] = jnp.zeros((P, 2 * W), f32)
    g = jnp.zeros((H, CW), f32)
    for kh in range(7):
        lhs = cp_buf[kh:kh + H, :].astype(bf16)
        g = g + jnp.dot(lhs, rs_ref[kh], preferred_element_type=f32)
    g = g + ss_ref[...]

    gate = 1.0 / (1.0 + jnp.exp(-g))                        # sigmoid
    o_ref[0] = (f * gate + s).astype(o_ref.dtype)           # lane-dense store


# ----------------------------------------------------------------------------
# Wrapper
# ----------------------------------------------------------------------------
def dsam_add1_forward(x_nchw, params):
    x_nchw = x_nchw.astype(jnp.float32)
    N, Cin0, H, W = x_nchw.shape
    C = Cin0 // 2
    CW = C * W

    def layer(name, padding, dilation, rep_out=1):
        w, g, b, m, v = params[name]
        w_hwio, shift = _fold_conv_bn(w, g, b, m, v)
        return (_lower_taps(w_hwio, W, padding, dilation, rep_out),
                _shift_row(shift, W, rep_out))

    ri, si = layer("convInit", 0, 1)          # (1, 2C*W, CW)
    r1, s1 = layer("dilate1", 1, 1)           # (3, CW, CW)
    r2, s2 = layer("dilate2", 2, 2)
    r3, s3 = layer("dilate3", 4, 4)
    r4, s4 = layer("dilate4", 8, 8)
    rf, sf = layer("convFinal", 0, 1)         # (1, CW, CW)
    rs, ss = layer("spatial", 3, 1, rep_out=C)  # (7, 2W, CW), gate broadcast baked in
    ri, rf = ri[0], rf[0]

    # channel-major lane layout: (N, H, Cin*W), lane = ci*W + w
    x_lanes = jnp.transpose(x_nchw, (0, 2, 1, 3)).reshape(N, H, Cin0 * W)
    x_lanes = x_lanes.astype(jnp.bfloat16)

    def full2d(a):
        return pl.BlockSpec(a.shape, lambda n: (0, 0))

    def full3d(a):
        return pl.BlockSpec(a.shape, lambda n: (0, 0, 0))

    in_specs = [
        pl.BlockSpec((1, H, Cin0 * W), lambda n: (n, 0, 0)),
        full2d(ri), full2d(si),
        full3d(r1), full2d(s1),
        full3d(r2), full2d(s2),
        full3d(r3), full2d(s3),
        full3d(r4), full2d(s4),
        full2d(rf), full2d(sf),
        full3d(rs), full2d(ss),
    ]

    scratch_shapes = [
        pltpu.VMEM((H + 2, CW), jnp.float32),        # dilate1 H-halo buffer
        pltpu.VMEM((H + 4, CW), jnp.float32),        # dilate2
        pltpu.VMEM((H + 8, CW), jnp.float32),        # dilate3
        pltpu.VMEM((H + 16, CW), jnp.float32),       # dilate4
        pltpu.VMEM((H + 6, 2 * W), jnp.float32),     # spatial-gate halo buffer
    ]

    kernel = functools.partial(_dsam_kernel, H=H, W=W, C=C)

    out = pl.pallas_call(
        kernel,
        out_shape=jax.ShapeDtypeStruct((N, H, CW), jnp.float32),
        grid_spec=pltpu.PrefetchScalarGridSpec(
            num_scalar_prefetch=0,
            grid=(N,),
            in_specs=in_specs,
            out_specs=pl.BlockSpec((1, H, CW), lambda n: (n, 0, 0)),
            scratch_shapes=scratch_shapes,
        ),
        compiler_params=pltpu.CompilerParams(dimension_semantics=("parallel",)),
    )(x_lanes, ri, si, r1, s1, r2, s2, r3, s3, r4, s4, rf, sf, rs, ss)

    # (N, H, C*W) -> (N, C, H, W)
    return jnp.transpose(out.reshape(N, H, C, W), (0, 2, 1, 3))


# ----------------------------------------------------------------------------
# Pure-JAX reference (inference-mode BN, bf16 convs like the kernel)
# ----------------------------------------------------------------------------
def _conv_bn_act_ref(x_nhwc, p, *, padding, dilation, relu):
    w_oihw, gamma, beta, mean, var = p
    w_hwio, shift = _fold_conv_bn(w_oihw, gamma, beta, mean, var)
    y = jax.lax.conv_general_dilated(
        x_nhwc.astype(jnp.bfloat16), w_hwio.astype(jnp.bfloat16),
        window_strides=(1, 1),
        padding=[(padding, padding), (padding, padding)],
        rhs_dilation=(dilation, dilation),
        dimension_numbers=("NHWC", "HWIO", "NHWC"),
        preferred_element_type=jnp.float32)
    y = y + shift[None, None, None, :]
    return jnp.maximum(y, 0.0) if relu else y


def dsam_add1_ref(x_nchw, params):
    x = jnp.transpose(x_nchw, (0, 2, 3, 1)).astype(jnp.float32)
    x0 = _conv_bn_act_ref(x,  params["convInit"], padding=0, dilation=1, relu=True)
    d1 = _conv_bn_act_ref(x0, params["dilate1"],  padding=1, dilation=1, relu=True)
    d2 = _conv_bn_act_ref(d1, params["dilate2"],  padding=2, dilation=2, relu=True)
    d3 = _conv_bn_act_ref(d2, params["dilate3"],  padding=4, dilation=4, relu=True)
    d4 = _conv_bn_act_ref(d3, params["dilate4"],  padding=8, dilation=8, relu=True)
    s = d1 + d2 + d3 + d4 + x0
    f = _conv_bn_act_ref(s, params["convFinal"],  padding=0, dilation=1, relu=True)
    cp = jnp.concatenate([jnp.max(f, axis=-1, keepdims=True),
                          jnp.mean(f, axis=-1, keepdims=True)], axis=-1)
    g = _conv_bn_act_ref(cp, params["spatial"],   padding=3, dilation=1, relu=False)
    out = f * jax.nn.sigmoid(g) + s
    return jnp.transpose(out, (0, 3, 1, 2))


# ----------------------------------------------------------------------------
# Self-check
# ----------------------------------------------------------------------------
def make_conv_params(key, cin, cout, k):
    kw_, kg, kb, km, kv = jax.random.split(key, 5)
    w = jax.random.normal(kw_, (cout, cin, k, k), jnp.float32) * (2.0 / (cin * k * k)) ** 0.5
    gamma = 1.0 + 0.1 * jax.random.normal(kg, (cout,), jnp.float32)
    beta = 0.1 * jax.random.normal(kb, (cout,), jnp.float32)
    mean = 0.1 * jax.random.normal(km, (cout,), jnp.float32)
    var = 0.5 + jnp.abs(jax.random.normal(kv, (cout,), jnp.float32))
    return (w, gamma, beta, mean, var)


if __name__ == "__main__":
    channel = 8
    N, H, W = 2, 16, 16

    key = jax.random.PRNGKey(0)
    kx, k1, k2, k3, k4, k5, k6, k7 = jax.random.split(key, 8)
    x = jax.random.normal(kx, (N, 2 * channel, H, W), jnp.float32)
    params = {
        "convInit":  make_conv_params(k1, 2 * channel, channel, 1),
        "dilate1":   make_conv_params(k2, channel, channel, 3),
        "dilate2":   make_conv_params(k3, channel, channel, 3),
        "dilate3":   make_conv_params(k4, channel, channel, 3),
        "dilate4":   make_conv_params(k5, channel, channel, 3),
        "convFinal": make_conv_params(k6, channel, channel, 1),
        "spatial":   make_conv_params(k7, 2, 1, 7),
    }

    out = jax.block_until_ready(jax.jit(dsam_add1_forward)(x, params))
    ref = jax.block_until_ready(dsam_add1_ref(x, params))

    assert out.shape == (N, channel, H, W), out.shape
    max_err = float(jnp.max(jnp.abs(out - ref)))
    assert jnp.allclose(out, ref, atol=2e-2, rtol=2e-2), f"max_abs_err={max_err}"
    print("KERNEL_OK")
</pallas_src>

<mosaic_0001>
module attributes {stable_mosaic.version = 11 : i64} {
  func.func @_dsam_kernel(%arg0: i32, %arg1: memref<1x16x256xbf16, #tpu.memory_space<vmem>>, %arg2: memref<256x128xbf16, #tpu.memory_space<vmem>>, %arg3: memref<1x128xf32, #tpu.memory_space<vmem>>, %arg4: memref<3x128x128xbf16, #tpu.memory_space<vmem>>, %arg5: memref<1x128xf32, #tpu.memory_space<vmem>>, %arg6: memref<3x128x128xbf16, #tpu.memory_space<vmem>>, %arg7: memref<1x128xf32, #tpu.memory_space<vmem>>, %arg8: memref<3x128x128xbf16, #tpu.memory_space<vmem>>, %arg9: memref<1x128xf32, #tpu.memory_space<vmem>>, %arg10: memref<3x128x128xbf16, #tpu.memory_space<vmem>>, %arg11: memref<1x128xf32, #tpu.memory_space<vmem>>, %arg12: memref<128x128xbf16, #tpu.memory_space<vmem>>, %arg13: memref<1x128xf32, #tpu.memory_space<vmem>>, %arg14: memref<7x32x128xbf16, #tpu.memory_space<vmem>>, %arg15: memref<1x128xf32, #tpu.memory_space<vmem>>, %arg16: memref<1x16x128xf32, #tpu.memory_space<vmem>>, %arg17: memref<18x128xf32, #tpu.memory_space<vmem>>, %arg18: memref<20x128xf32, #tpu.memory_space<vmem>>, %arg19: memref<24x128xf32, #tpu.memory_space<vmem>>, %arg20: memref<32x128xf32, #tpu.memory_space<vmem>>, %arg21: memref<22x32xf32, #tpu.memory_space<vmem>>) attributes {dimension_semantics = [#tpu.dimension_semantics<parallel>], iteration_bounds = array<i64: 2>, scalar_prefetch = 0 : i64, scratch_operands = 5 : i64, tpu.core_type = #tpu.core_type<tc>, window_params = [{transform_indices = @transform_0, window_bounds = array<i64: 1, 16, 256>}, {pipeline_mode = #tpu.pipeline_mode<synchronous>, transform_indices = @transform_1, window_bounds = array<i64: 256, 128>}, {pipeline_mode = #tpu.pipeline_mode<synchronous>, transform_indices = @transform_2, window_bounds = array<i64: 1, 128>}, {pipeline_mode = #tpu.pipeline_mode<synchronous>, transform_indices = @transform_3, window_bounds = array<i64: 3, 128, 128>}, {pipeline_mode = #tpu.pipeline_mode<synchronous>, transform_indices = @transform_4, window_bounds = array<i64: 1, 128>}, {pipeline_mode = #tpu.pipeline_mode<synchronous>, transform_indices = @transform_5, window_bounds = array<i64: 3, 128, 128>}, {pipeline_mode = #tpu.pipeline_mode<synchronous>, transform_indices = @transform_6, window_bounds = array<i64: 1, 128>}, {pipeline_mode = #tpu.pipeline_mode<synchronous>, transform_indices = @transform_7, window_bounds = array<i64: 3, 128, 128>}, {pipeline_mode = #tpu.pipeline_mode<synchronous>, transform_indices = @transform_8, window_bounds = array<i64: 1, 128>}, {pipeline_mode = #tpu.pipeline_mode<synchronous>, transform_indices = @transform_9, window_bounds = array<i64: 3, 128, 128>}, {pipeline_mode = #tpu.pipeline_mode<synchronous>, transform_indices = @transform_10, window_bounds = array<i64: 1, 128>}, {pipeline_mode = #tpu.pipeline_mode<synchronous>, transform_indices = @transform_11, window_bounds = array<i64: 128, 128>}, {pipeline_mode = #tpu.pipeline_mode<synchronous>, transform_indices = @transform_12, window_bounds = array<i64: 1, 128>}, {pipeline_mode = #tpu.pipeline_mode<synchronous>, transform_indices = @transform_13, window_bounds = array<i64: 7, 32, 128>}, {pipeline_mode = #tpu.pipeline_mode<synchronous>, transform_indices = @transform_14, window_bounds = array<i64: 1, 128>}, {transform_indices = @transform_15, window_bounds = array<i64: 1, 16, 128>}]} {
    %c0 = arith.constant 0 : index
    %c0_0 = arith.constant 0 : index
    %c0_1 = arith.constant 0 : index
    %0 = vector.load %arg1[%c0, %c0_0, %c0_1] : memref<1x16x256xbf16, #tpu.memory_space<vmem>>, vector<1x16x256xbf16>
    %1 = vector.shape_cast %0 : vector<1x16x256xbf16> to vector<16x256xbf16>
    %c0_2 = arith.constant 0 : index
    %c0_3 = arith.constant 0 : index
    %2 = vector.load %arg2[%c0_2, %c0_3] : memref<256x128xbf16, #tpu.memory_space<vmem>>, vector<256x128xbf16>
    %cst = arith.constant dense<0.000000e+00> : vector<16x128xf32>
    %3 = tpu.matmul %1, %2, %cst {dimension_numbers = #tpu.dot_dimension_numbers<[1], [0], [0], [1], [0, 0, 1, 1], [], []>} : vector<16x256xbf16>, vector<256x128xbf16>, vector<16x128xf32> -> vector<16x128xf32>
    %c0_4 = arith.constant 0 : index
    %c0_5 = arith.constant 0 : index
    %4 = vector.load %arg3[%c0_4, %c0_5] : memref<1x128xf32, #tpu.memory_space<vmem>>, vector<1x128xf32>
    %5 = vector.broadcast %4 : vector<1x128xf32> to vector<16x128xf32>
    %6 = arith.addf %3, %5 : vector<16x128xf32>
    %cst_6 = arith.constant 0.000000e+00 : f32
    %7 = vector.broadcast %cst_6 : f32 to vector<16x128xf32>
    %8 = arith.maximumf %6, %7 : vector<16x128xf32>
    %cst_7 = arith.constant 0.000000e+00 : f32
    %9 = vector.broadcast %cst_7 : f32 to vector<1x128xf32>
    %c0_8 = arith.constant 0 : index
    %c0_9 = arith.constant 0 : index
    %10 = vector.load %arg17[%c0_8, %c0_9] : memref<18x128xf32, #tpu.memory_space<vmem>>, vector<1x128xf32>
    tpu.vector_store %arg17[%c0_8, %c0_9], %9 {strides = array<i32>} : memref<18x128xf32, #tpu.memory_space<vmem>>, vector<1x128xf32>,
    %c1 = arith.constant 1 : index
    %c0_10 = arith.constant 0 : index
    %11 = vector.load %arg17[%c1, %c0_10] : memref<18x128xf32, #tpu.memory_space<vmem>>, vector<16x128xf32>
    tpu.vector_store %arg17[%c1, %c0_10], %8 {strides = array<i32>} : memref<18x128xf32, #tpu.memory_space<vmem>>, vector<16x128xf32>,
    %cst_11 = arith.constant 0.000000e+00 : f32
    %12 = vector.broadcast %cst_11 : f32 to vector<1x128xf32>
    %c17 = arith.constant 17 : index
    %c0_12 = arith.constant 0 : index
    %13 = vector.load %arg17[%c17, %c0_12] : memref<18x128xf32, #tpu.memory_space<vmem>>, vector<1x128xf32>
    tpu.vector_store %arg17[%c17, %c0_12], %12 {strides = array<i32>} : memref<18x128xf32, #tpu.memory_space<vmem>>, vector<1x128xf32>,
    %cst_13 = arith.constant 0.000000e+00 : f32
    %14 = vector.broadcast %cst_13 : f32 to vector<16x128xf32>
    %c0_14 = arith.constant 0 : index
    %c0_15 = arith.constant 0 : index
    %15 = vector.load %arg17[%c0_14, %c0_15] : memref<18x128xf32, #tpu.memory_space<vmem>>, vector<16x128xf32>
    %16 = arith.truncf %15 : vector<16x128xf32> to vector<16x128xbf16>
    %c0_16 = arith.constant 0 : index
    %c0_17 = arith.constant 0 : index
    %c0_18 = arith.constant 0 : index
    %17 = vector.load %arg4[%c0_16, %c0_17, %c0_18] : memref<3x128x128xbf16, #tpu.memory_space<vmem>>, vector<1x128x128xbf16>
    %18 = vector.shape_cast %17 : vector<1x128x128xbf16> to vector<128x128xbf16>
    %cst_19 = arith.constant dense<0.000000e+00> : vector<16x128xf32>
    %19 = tpu.matmul %16, %18, %cst_19 {dimension_numbers = #tpu.dot_dimension_numbers<[1], [0], [0], [1], [0, 0, 1, 1], [], []>} : vector<16x128xbf16>, vector<128x128xbf16>, vector<16x128xf32> -> vector<16x128xf32>
    %20 = arith.addf %14, %19 : vector<16x128xf32>
    %c1_20 = arith.constant 1 : index
    %c0_21 = arith.constant 0 : index
    %21 = vector.load %arg17[%c1_20, %c0_21] : memref<18x128xf32, #tpu.memory_space<vmem>>, vector<16x128xf32>
    %22 = arith.truncf %21 : vector<16x128xf32> to vector<16x128xbf16>
    %c1_22 = arith.constant 1 : index
    %c0_23 = arith.constant 0 : index
    %c0_24 = arith.constant 0 : index
    %23 = vector.load %arg4[%c1_22, %c0_23, %c0_24] : memref<3x128x128xbf16, #tpu.memory_space<vmem>>, vector<1x128x128xbf16>
    %24 = vector.shape_cast %23 : vector<1x128x128xbf16> to vector<128x128xbf16>
    %cst_25 = arith.constant dense<0.000000e+00> : vector<16x128xf32>
    %25 = tpu.matmul %22, %24, %cst_25 {dimension_numbers = #tpu.dot_dimension_numbers<[1], [0], [0], [1], [0, 0, 1, 1], [], []>} : vector<16x128xbf16>, vector<128x128xbf16>, vector<16x128xf32> -> vector<16x128xf32>
    %26 = arith.addf %20, %25 : vector<16x128xf32>
    %c2 = arith.constant 2 : index
    %c0_26 = arith.constant 0 : index
    %27 = vector.load %arg17[%c2, %c0_26] : memref<18x128xf32, #tpu.memory_space<vmem>>, vector<16x128xf32>
    %28 = arith.truncf %27 : vector<16x128xf32> to vector<16x128xbf16>
    %c2_27 = arith.constant 2 : index
    %c0_28 = arith.constant 0 : index
    %c0_29 = arith.constant 0 : index
    %29 = vector.load %arg4[%c2_27, %c0_28, %c0_29] : memref<3x128x128xbf16, #tpu.memory_space<vmem>>, vector<1x128x128xbf16>
    %30 = vector.shape_cast %29 : vector<1x128x128xbf16> to vector<128x128xbf16>
    %cst_30 = arith.constant dense<0.000000e+00> : vector<16x128xf32>
    %31 = tpu.matmul %28, %30, %cst_30 {dimension_numbers = #tpu.dot_dimension_numbers<[1], [0], [0], [1], [0, 0, 1, 1], [], []>} : vector<16x128xbf16>, vector<128x128xbf16>, vector<16x128xf32> -> vector<16x128xf32>
    %32 = arith.addf %26, %31 : vector<16x128xf32>
    %c0_31 = arith.constant 0 : index
    %c0_32 = arith.constant 0 : index
    %33 = vector.load %arg5[%c0_31, %c0_32] : memref<1x128xf32, #tpu.memory_space<vmem>>, vector<1x128xf32>
    %34 = vector.broadcast %33 : vector<1x128xf32> to vector<16x128xf32>
    %35 = arith.addf %32, %34 : vector<16x128xf32>
    %cst_33 = arith.constant 0.000000e+00 : f32
    %36 = vector.broadcast %cst_33 : f32 to vector<16x128xf32>
    %37 = arith.maximumf %35, %36 : vector<16x128xf32>
    %cst_34 = arith.constant 0.000000e+00 : f32
    %38 = vector.broadcast %cst_34 : f32 to vector<2x128xf32>
    %c0_35 = arith.constant 0 : index
    %c0_36 = arith.constant 0 : index
    %39 = vector.load %arg18[%c0_35, %c0_36] : memref<20x128xf32, #tpu.memory_space<vmem>>, vector<2x128xf32>
    tpu.vector_store %arg18[%c0_35, %c0_36], %38 {strides = array<i32>} : memref<20x128xf32, #tpu.memory_space<vmem>>, vector<2x128xf32>,
    %c2_37 = arith.constant 2 : index
    %c0_38 = arith.constant 0 : index
    %40 = vector.load %arg18[%c2_37, %c0_38] : memref<20x128xf32, #tpu.memory_space<vmem>>, vector<16x128xf32>
    tpu.vector_store %arg18[%c2_37, %c0_38], %37 {strides = array<i32>} : memref<20x128xf32, #tpu.memory_space<vmem>>, vector<16x128xf32>,
    %cst_39 = arith.constant 0.000000e+00 : f32
    %41 = vector.broadcast %cst_39 : f32 to vector<2x128xf32>
    %c18 = arith.constant 18 : index
    %c0_40 = arith.constant 0 : index
    %42 = vector.load %arg18[%c18, %c0_40] : memref<20x128xf32, #tpu.memory_space<vmem>>, vector<2x128xf32>
    tpu.vector_store %arg18[%c18, %c0_40], %41 {strides = array<i32>} : memref<20x128xf32, #tpu.memory_space<vmem>>, vector<2x128xf32>,
    %cst_41 = arith.constant 0.000000e+00 : f32
    %43 = vector.broadcast %cst_41 : f32 to vector<16x128xf32>
    %c0_42 = arith.constant 0 : index
    %c0_43 = arith.constant 0 : index
    %44 = vector.load %arg18[%c0_42, %c0_43] : memref<20x128xf32, #tpu.memory_space<vmem>>, vector<16x128xf32>
    %45 = arith.truncf %44 : vector<16x128xf32> to vector<16x128xbf16>
    %c0_44 = arith.constant 0 : index
    %c0_45 = arith.constant 0 : index
    %c0_46 = arith.constant 0 : index
    %46 = vector.load %arg6[%c0_44, %c0_45, %c0_46] : memref<3x128x128xbf16, #tpu.memory_space<vmem>>, vector<1x128x128xbf16>
    %47 = vector.shape_cast %46 : vector<1x128x128xbf16> to vector<128x128xbf16>
    %cst_47 = arith.constant dense<0.000000e+00> : vector<16x128xf32>
    %48 = tpu.matmul %45, %47, %cst_47 {dimension_numbers = #tpu.dot_dimension_numbers<[1], [0], [0], [1], [0, 0, 1, 1], [], []>} : vector<16x128xbf16>, vector<128x128xbf16>, vector<16x128xf32> -> vector<16x128xf32>
    %49 = arith.addf %43, %48 : vector<16x128xf32>
    %c2_48 = arith.constant 2 : index
    %c0_49 = arith.constant 0 : index
    %50 = vector.load %arg18[%c2_48, %c0_49] : memref<20x128xf32, #tpu.memory_space<vmem>>, vector<16x128xf32>
    %51 = arith.truncf %50 : vector<16x128xf32> to vector<16x128xbf16>
    %c1_50 = arith.constant 1 : index
    %c0_51 = arith.constant 0 : index
    %c0_52 = arith.constant 0 : index
    %52 = vector.load %arg6[%c1_50, %c0_51, %c0_52] : memref<3x128x128xbf16, #tpu.memory_space<vmem>>, vector<1x128x128xbf16>
    %53 = vector.shape_cast %52 : vector<1x128x128xbf16> to vector<128x128xbf16>
    %cst_53 = arith.constant dense<0.000000e+00> : vector<16x128xf32>
    %54 = tpu.matmul %51, %53, %cst_53 {dimension_numbers = #tpu.dot_dimension_numbers<[1], [0], [0], [1], [0, 0, 1, 1], [], []>} : vector<16x128xbf16>, vector<128x128xbf16>, vector<16x128xf32> -> vector<16x128xf32>
    %55 = arith.addf %49, %54 : vector<16x128xf32>
    %c4 = arith.constant 4 : index
    %c0_54 = arith.constant 0 : index
    %56 = vector.load %arg18[%c4, %c0_54] : memref<20x128xf32, #tpu.memory_space<vmem>>, vector<16x128xf32>
    %57 = arith.truncf %56 : vector<16x128xf32> to vector<16x128xbf16>
    %c2_55 = arith.constant 2 : index
    %c0_56 = arith.constant 0 : index
    %c0_57 = arith.constant 0 : index
    %58 = vector.load %arg6[%c2_55, %c0_56, %c0_57] : memref<3x128x128xbf16, #tpu.memory_space<vmem>>, vector<1x128x128xbf16>
    %59 = vector.shape_cast %58 : vector<1x128x128xbf16> to vector<128x128xbf16>
    %cst_58 = arith.constant dense<0.000000e+00> : vector<16x128xf32>
    %60 = tpu.matmul %57, %59, %cst_58 {dimension_numbers = #tpu.dot_dimension_numbers<[1], [0], [0], [1], [0, 0, 1, 1], [], []>} : vector<16x128xbf16>, vector<128x128xbf16>, vector<16x128xf32> -> vector<16x128xf32>
    %61 = arith.addf %55, %60 : vector<16x128xf32>
    %c0_59 = arith.constant 0 : index
    %c0_60 = arith.constant 0 : index
    %62 = vector.load %arg7[%c0_59, %c0_60] : memref<1x128xf32, #tpu.memory_space<vmem>>, vector<1x128xf32>
    %63 = vector.broadcast %62 : vector<1x128xf32> to vector<16x128xf32>
    %64 = arith.addf %61, %63 : vector<16x128xf32>
    %cst_61 = arith.constant 0.000000e+00 : f32
    %65 = vector.broadcast %cst_61 : f32 to vector<16x128xf32>
    %66 = arith.maximumf %64, %65 : vector<16x128xf32>
    %cst_62 = arith.constant 0.000000e+00 : f32
    %67 = vector.broadcast %cst_62 : f32 to vector<4x128xf32>
    %c0_63 = arith.constant 0 : index
    %c0_64 = arith.constant 0 : index
    %68 = vector.load %arg19[%c0_63, %c0_64] : memref<24x128xf32, #tpu.memory_space<vmem>>, vector<4x128xf32>
    tpu.vector_store %arg19[%c0_63, %c0_64], %67 {strides = array<i32>} : memref<24x128xf32, #tpu.memory_space<vmem>>, vector<4x128xf32>,
    %c4_65 = arith.constant 4 : index
    %c0_66 = arith.constant 0 : index
    %69 = vector.load %arg19[%c4_65, %c0_66] : memref<24x128xf32, #tpu.memory_space<vmem>>, vector<16x128xf32>
    tpu.vector_store %arg19[%c4_65, %c0_66], %66 {strides = array<i32>} : memref<24x128xf32, #tpu.memory_space<vmem>>, vector<16x128xf32>,
    %cst_67 = arith.constant 0.000000e+00 : f32
    %70 = vector.broadcast %cst_67 : f32 to vector<4x128xf32>
    %c20 = arith.constant 20 : index
    %c0_68 = arith.constant 0 : index
    %71 = vector.load %arg19[%c20, %c0_68] : memref<24x128xf32, #tpu.memory_space<vmem>>, vector<4x128xf32>
    tpu.vector_store %arg19[%c20, %c0_68], %70 {strides = array<i32>} : memref<24x128xf32, #tpu.memory_space<vmem>>, vector<4x128xf32>,
    %cst_69 = arith.constant 0.000000e+00 : f32
    %72 = vector.broadcast %cst_69 : f32 to vector<16x128xf32>
    %c0_70 = arith.constant 0 : index
    %c0_71 = arith.constant 0 : index
    %73 = vector.load %arg19[%c0_70, %c0_71] : memref<24x128xf32, #tpu.memory_space<vmem>>, vector<16x128xf32>
    %74 = arith.truncf %73 : vector<16x128xf32> to vector<16x128xbf16>
    %c0_72 = arith.constant 0 : index
    %c0_73 = arith.constant 0 : index
    %c0_74 = arith.constant 0 : index
    %75 = vector.load %arg8[%c0_72, %c0_73, %c0_74] : memref<3x128x128xbf16, #tpu.memory_space<vmem>>, vector<1x128x128xbf16>
    %76 = vector.shape_cast %75 : vector<1x128x128xbf16> to vector<128x128xbf16>
    %cst_75 = arith.constant dense<0.000000e+00> : vector<16x128xf32>
    %77 = tpu.matmul %74, %76, %cst_75 {dimension_numbers = #tpu.dot_dimension_numbers<[1], [0], [0], [1], [0, 0, 1, 1], [], []>} : vector<16x128xbf16>, vector<128x128xbf16>, vector<16x128xf32> -> vector<16x128xf32>
    %78 = arith.addf %72, %77 : vector<16x128xf32>
    %c4_76 = arith.constant 4 : index
    %c0_77 = arith.constant 0 : index
    %79 = vector.load %arg19[%c4_76, %c0_77] : memref<24x128xf32, #tpu.memory_space<vmem>>, vector<16x128xf32>
    %80 = arith.truncf %79 : vector<16x128xf32> to vector<16x128xbf16>
    %c1_78 = arith.constant 1 : index
    %c0_79 = arith.constant 0 : index
    %c0_80 = arith.constant 0 : index
    %81 = vector.load %arg8[%c1_78, %c0_79, %c0_80] : memref<3x128x128xbf16, #tpu.memory_space<vmem>>, vector<1x128x128xbf16>
    %82 = vector.shape_cast %81 : vector<1x128x128xbf16> to vector<128x128xbf16>
    %cst_81 = arith.constant dense<0.000000e+00> : vector<16x128xf32>
    %83 = tpu.matmul %80, %82, %cst_81 {dimension_numbers = #tpu.dot_dimension_numbers<[1], [0], [0], [1], [0, 0, 1, 1], [], []>} : vector<16x128xbf16>, vector<128x128xbf16>, vector<16x128xf32> -> vector<16x128xf32>
    %84 = arith.addf %78, %83 : vector<16x128xf32>
    %c8 = arith.constant 8 : index
    %c0_82 = arith.constant 0 : index
    %85 = vector.load %arg19[%c8, %c0_82] : memref<24x128xf32, #tpu.memory_space<vmem>>, vector<16x128xf32>
    %86 = arith.truncf %85 : vector<16x128xf32> to vector<16x128xbf16>
    %c2_83 = arith.constant 2 : index
    %c0_84 = arith.constant 0 : index
    %c0_85 = arith.constant 0 : index
    %87 = vector.load %arg8[%c2_83, %c0_84, %c0_85] : memref<3x128x128xbf16, #tpu.memory_space<vmem>>, vector<1x128x128xbf16>
    %88 = vector.shape_cast %87 : vector<1x128x128xbf16> to vector<128x128xbf16>
    %cst_86 = arith.constant dense<0.000000e+00> : vector<16x128xf32>
    %89 = tpu.matmul %86, %88, %cst_86 {dimension_numbers = #tpu.dot_dimension_numbers<[1], [0], [0], [1], [0, 0, 1, 1], [], []>} : vector<16x128xbf16>, vector<128x128xbf16>, vector<16x128xf32> -> vector<16x128xf32>
    %90 = arith.addf %84, %89 : vector<16x128xf32>
    %c0_87 = arith.constant 0 : index
    %c0_88 = arith.constant 0 : index
    %91 = vector.load %arg9[%c0_87, %c0_88] : memref<1x128xf32, #tpu.memory_space<vmem>>, vector<1x128xf32>
    %92 = vector.broadcast %91 : vector<1x128xf32> to vector<16x128xf32>
    %93 = arith.addf %90, %92 : vector<16x128xf32>
    %cst_89 = arith.constant 0.000000e+00 : f32
    %94 = vector.broadcast %cst_89 : f32 to vector<16x128xf32>
    %95 = arith.maximumf %93, %94 : vector<16x128xf32>
    %cst_90 = arith.constant 0.000000e+00 : f32
    %96 = vector.broadcast %cst_90 : f32 to vector<8x128xf32>
    %c0_91 = arith.constant 0 : index
    %c0_92 = arith.constant 0 : index
    %97 = vector.load %arg20[%c0_91, %c0_92] : memref<32x128xf32, #tpu.memory_space<vmem>>, vector<8x128xf32>
    tpu.vector_store %arg20[%c0_91, %c0_92], %96 {strides = array<i32>} : memref<32x128xf32, #tpu.memory_space<vmem>>, vector<8x128xf32>,
    %c8_93 = arith.constant 8 : index
    %c0_94 = arith.constant 0 : index
    %98 = vector.load %arg20[%c8_93, %c0_94] : memref<32x128xf32, #tpu.memory_space<vmem>>, vector<16x128xf32>
    tpu.vector_store %arg20[%c8_93, %c0_94], %95 {strides = array<i32>} : memref<32x128xf32, #tpu.memory_space<vmem>>, vector<16x128xf32>,
    %cst_95 = arith.constant 0.000000e+00 : f32
    %99 = vector.broadcast %cst_95 : f32 to vector<8x128xf32>
    %c24 = arith.constant 24 : index
    %c0_96 = arith.constant 0 : index
    %100 = vector.load %arg20[%c24, %c0_96] : memref<32x128xf32, #tpu.memory_space<vmem>>, vector<8x128xf32>
    tpu.vector_store %arg20[%c24, %c0_96], %99 {strides = array<i32>} : memref<32x128xf32, #tpu.memory_space<vmem>>, vector<8x128xf32>,
    %cst_97 = arith.constant 0.000000e+00 : f32
    %101 = vector.broadcast %cst_97 : f32 to vector<16x128xf32>
    %c0_98 = arith.constant 0 : index
    %c0_99 = arith.constant 0 : index
    %102 = vector.load %arg20[%c0_98, %c0_99] : memref<32x128xf32, #tpu.memory_space<vmem>>, vector<16x128xf32>
    %103 = arith.truncf %102 : vector<16x128xf32> to vector<16x128xbf16>
    %c0_100 = arith.constant 0 : index
    %c0_101 = arith.constant 0 : index
    %c0_102 = arith.constant 0 : index
    %104 = vector.load %arg10[%c0_100, %c0_101, %c0_102] : memref<3x128x128xbf16, #tpu.memory_space<vmem>>, vector<1x128x128xbf16>
    %105 = vector.shape_cast %104 : vector<1x128x128xbf16> to vector<128x128xbf16>
    %cst_103 = arith.constant dense<0.000000e+00> : vector<16x128xf32>
    %106 = tpu.matmul %103, %105, %cst_103 {dimension_numbers = #tpu.dot_dimension_numbers<[1], [0], [0], [1], [0, 0, 1, 1], [], []>} : vector<16x128xbf16>, vector<128x128xbf16>, vector<16x128xf32> -> vector<16x128xf32>
    %107 = arith.addf %101, %106 : vector<16x128xf32>
    %c8_104 = arith.constant 8 : index
    %c0_105 = arith.constant 0 : index
    %108 = vector.load %arg20[%c8_104, %c0_105] : memref<32x128xf32, #tpu.memory_space<vmem>>, vector<16x128xf32>
    %109 = arith.truncf %108 : vector<16x128xf32> to vector<16x128xbf16>
    %c1_106 = arith.constant 1 : index
    %c0_107 = arith.constant 0 : index
    %c0_108 = arith.constant 0 : index
    %110 = vector.load %arg10[%c1_106, %c0_107, %c0_108] : memref<3x128x128xbf16, #tpu.memory_space<vmem>>, vector<1x128x128xbf16>
    %111 = vector.shape_cast %110 : vector<1x128x128xbf16> to vector<128x128xbf16>
    %cst_109 = arith.constant dense<0.000000e+00> : vector<16x128xf32>
    %112 = tpu.matmul %109, %111, %cst_109 {dimension_numbers = #tpu.dot_dimension_numbers<[1], [0], [0], [1], [0, 0, 1, 1], [], []>} : vector<16x128xbf16>, vector<128x128xbf16>, vector<16x128xf32> -> vector<16x128xf32>
    %113 = arith.addf %107, %112 : vector<16x128xf32>
    %c16 = arith.constant 16 : index
    %c0_110 = arith.constant 0 : index
    %114 = vector.load %arg20[%c16, %c0_110] : memref<32x128xf32, #tpu.memory_space<vmem>>, vector<16x128xf32>
    %115 = arith.truncf %114 : vector<16x128xf32> to vector<16x128xbf16>
    %c2_111 = arith.constant 2 : index
    %c0_112 = arith.constant 0 : index
    %c0_113 = arith.constant 0 : index
    %116 = vector.load %arg10[%c2_111, %c0_112, %c0_113] : memref<3x128x128xbf16, #tpu.memory_space<vmem>>, vector<1x128x128xbf16>
    %117 = vector.shape_cast %116 : vector<1x128x128xbf16> to vector<128x128xbf16>
    %cst_114 = arith.constant dense<0.000000e+00> : vector<16x128xf32>
    %118 = tpu.matmul %115, %117, %cst_114 {dimension_numbers = #tpu.dot_dimension_numbers<[1], [0], [0], [1], [0, 0, 1, 1], [], []>} : vector<16x128xbf16>, vector<128x128xbf16>, vector<16x128xf32> -> vector<16x128xf32>
    %119 = arith.addf %113, %118 : vector<16x128xf32>
    %c0_115 = arith.constant 0 : index
    %c0_116 = arith.constant 0 : index
    %120 = vector.load %arg11[%c0_115, %c0_116] : memref<1x128xf32, #tpu.memory_space<vmem>>, vector<1x128xf32>
    %121 = vector.broadcast %120 : vector<1x128xf32> to vector<16x128xf32>
    %122 = arith.addf %119, %121 : vector<16x128xf32>
    %cst_117 = arith.constant 0.000000e+00 : f32
    %123 = vector.broadcast %cst_117 : f32 to vector<16x128xf32>
    %124 = arith.maximumf %122, %123 : vector<16x128xf32>
    %125 = arith.addf %37, %66 : vector<16x128xf32>
    %126 = arith.addf %125, %95 : vector<16x128xf32>
    %127 = arith.addf %126, %124 : vector<16x128xf32>
    %128 = arith.addf %127, %8 : vector<16x128xf32>
    %129 = arith.truncf %128 : vector<16x128xf32> to vector<16x128xbf16>
    %c0_118 = arith.constant 0 : index
    %c0_119 = arith.constant 0 : index
    %130 = vector.load %arg12[%c0_118, %c0_119] : memref<128x128xbf16, #tpu.memory_space<vmem>>, vector<128x128xbf16>
    %cst_120 = arith.constant dense<0.000000e+00> : vector<16x128xf32>
    %131 = tpu.matmul %129, %130, %cst_120 {dimension_numbers = #tpu.dot_dimension_numbers<[1], [0], [0], [1], [0, 0, 1, 1], [], []>} : vector<16x128xbf16>, vector<128x128xbf16>, vector<16x128xf32> -> vector<16x128xf32>
    %c0_121 = arith.constant 0 : index
    %c0_122 = arith.constant 0 : index
    %132 = vector.load %arg13[%c0_121, %c0_122] : memref<1x128xf32, #tpu.memory_space<vmem>>, vector<1x128xf32>
    %133 = vector.broadcast %132 : vector<1x128xf32> to vector<16x128xf32>
    %134 = arith.addf %131, %133 : vector<16x128xf32>
    %cst_123 = arith.constant 0.000000e+00 : f32
    %135 = vector.broadcast %cst_123 : f32 to vector<16x128xf32>
    %136 = arith.maximumf %134, %135 : vector<16x128xf32>
    %137 = vector.extract_strided_slice %136 {offsets = [0, 0], sizes = [16, 16], strides = [1, 1]} : vector<16x128xf32> to vector<16x16xf32>
    %138 = vector.extract_strided_slice %136 {offsets = [0, 0], sizes = [16, 16], strides = [1, 1]} : vector<16x128xf32> to vector<16x16xf32>
    %139 = vector.extract_strided_slice %136 {offsets = [0, 16], sizes = [16, 16], strides = [1, 1]} : vector<16x128xf32> to vector<16x16xf32>
    %140 = arith.maximumf %137, %139 : vector<16x16xf32>
    %141 = arith.addf %138, %139 : vector<16x16xf32>
    %142 = vector.extract_strided_slice %136 {offsets = [0, 32], sizes = [16, 16], strides = [1, 1]} : vector<16x128xf32> to vector<16x16xf32>
    %143 = arith.maximumf %140, %142 : vector<16x16xf32>
    %144 = arith.addf %141, %142 : vector<16x16xf32>
    %145 = vector.extract_strided_slice %136 {offsets = [0, 48], sizes = [16, 16], strides = [1, 1]} : vector<16x128xf32> to vector<16x16xf32>
    %146 = arith.maximumf %143, %145 : vector<16x16xf32>
    %147 = arith.addf %144, %145 : vector<16x16xf32>
    %148 = vector.extract_strided_slice %136 {offsets = [0, 64], sizes = [16, 16], strides = [1, 1]} : vector<16x128xf32> to vector<16x16xf32>
    %149 = arith.maximumf %146, %148 : vector<16x16xf32>
    %150 = arith.addf %147, %148 : vector<16x16xf32>
    %151 = vector.extract_strided_slice %136 {offsets = [0, 80], sizes = [16, 16], strides = [1, 1]} : vector<16x128xf32> to vector<16x16xf32>
    %152 = arith.maximumf %149, %151 : vector<16x16xf32>
    %153 = arith.addf %150, %151 : vector<16x16xf32>
    %154 = vector.extract_strided_slice %136 {offsets = [0, 96], sizes = [16, 16], strides = [1, 1]} : vector<16x128xf32> to vector<16x16xf32>
    %155 = arith.maximumf %152, %154 : vector<16x16xf32>
    %156 = arith.addf %153, %154 : vector<16x16xf32>
    %157 = vector.extract_strided_slice %136 {offsets = [0, 112], sizes = [16, 16], strides = [1, 1]} : vector<16x128xf32> to vector<16x16xf32>
    %158 = arith.maximumf %155, %157 : vector<16x16xf32>
    %159 = arith.addf %156, %157 : vector<16x16xf32>
    %cst_124 = arith.constant 1.250000e-01 : f32
    %160 = vector.broadcast %cst_124 : f32 to vector<16x16xf32>
    %161 = arith.mulf %159, %160 : vector<16x16xf32>
    %cst_125 = arith.constant 0.000000e+00 : f32
    %162 = vector.broadcast %cst_125 : f32 to vector<3x32xf32>
    %c0_126 = arith.constant 0 : index
    %c0_127 = arith.constant 0 : index
    %163 = vector.load %arg21[%c0_126, %c0_127] : memref<22x32xf32, #tpu.memory_space<vmem>>, vector<3x32xf32>
    tpu.vector_store %arg21[%c0_126, %c0_127], %162 {strides = array<i32>} : memref<22x32xf32, #tpu.memory_space<vmem>>, vector<3x32xf32>,
    %c3 = arith.constant 3 : index
    %c0_128 = arith.constant 0 : index
    %164 = vector.load %arg21[%c3, %c0_128] : memref<22x32xf32, #tpu.memory_space<vmem>>, vector<16x16xf32>
    tpu.vector_store %arg21[%c3, %c0_128], %158 {strides = array<i32>} : memref<22x32xf32, #tpu.memory_space<vmem>>, vector<16x16xf32>,
    %c3_129 = arith.constant 3 : index
    %c16_130 = arith.constant 16 : index
    %165 = vector.load %arg21[%c3_129, %c16_130] : memref<22x32xf32, #tpu.memory_space<vmem>>, vector<16x16xf32>
    tpu.vector_store %arg21[%c3_129, %c16_130], %161 {strides = array<i32>} : memref<22x32xf32, #tpu.memory_space<vmem>>, vector<16x16xf32>,
    %cst_131 = arith.constant 0.000000e+00 : f32
    %166 = vector.broadcast %cst_131 : f32 to vector<3x32xf32>
    %c19 = arith.constant 19 : index
    %c0_132 = arith.constant 0 : index
    %167 = vector.load %arg21[%c19, %c0_132] : memref<22x32xf32, #tpu.memory_space<vmem>>, vector<3x32xf32>
    tpu.vector_store %arg21[%c19, %c0_132], %166 {strides = array<i32>} : memref<22x32xf32, #tpu.memory_space<vmem>>, vector<3x32xf32>,
    %cst_133 = arith.constant 0.000000e+00 : f32
    %168 = vector.broadcast %cst_133 : f32 to vector<16x128xf32>
    %c0_134 = arith.constant 0 : index
    %c0_135 = arith.constant 0 : index
    %169 = vector.load %arg21[%c0_134, %c0_135] : memref<22x32xf32, #tpu.memory_space<vmem>>, vector<16x32xf32>
    %170 = arith.truncf %169 : vector<16x32xf32> to vector<16x32xbf16>
    %c0_136 = arith.constant 0 : index
    %c0_137 = arith.constant 0 : index
    %c0_138 = arith.constant 0 : index
    %171 = vector.load %arg14[%c0_136, %c0_137, %c0_138] : memref<7x32x128xbf16, #tpu.memory_space<vmem>>, vector<1x32x128xbf16>
    %172 = vector.shape_cast %171 : vector<1x32x128xbf16> to vector<32x128xbf16>
    %cst_139 = arith.constant dense<0.000000e+00> : vector<16x128xf32>
    %173 = tpu.matmul %170, %172, %cst_139 {dimension_numbers = #tpu.dot_dimension_numbers<[1], [0], [0], [1], [0, 0, 1, 1], [], []>} : vector<16x32xbf16>, vector<32x128xbf16>, vector<16x128xf32> -> vector<16x128xf32>
    %174 = arith.addf %168, %173 : vector<16x128xf32>
    %c1_140 = arith.constant 1 : index
    %c0_141 = arith.constant 0 : index
    %175 = vector.load %arg21[%c1_140, %c0_141] : memref<22x32xf32, #tpu.memory_space<vmem>>, vector<16x32xf32>
    %176 = arith.truncf %175 : vector<16x32xf32> to vector<16x32xbf16>
    %c1_142 = arith.constant 1 : index
    %c0_143 = arith.constant 0 : index
    %c0_144 = arith.constant 0 : index
    %177 = vector.load %arg14[%c1_142, %c0_143, %c0_144] : memref<7x32x128xbf16, #tpu.memory_space<vmem>>, vector<1x32x128xbf16>
    %178 = vector.shape_cast %177 : vector<1x32x128xbf16> to vector<32x128xbf16>
    %cst_145 = arith.constant dense<0.000000e+00> : vector<16x128xf32>
    %179 = tpu.matmul %176, %178, %cst_145 {dimension_numbers = #tpu.dot_dimension_numbers<[1], [0], [0], [1], [0, 0, 1, 1], [], []>} : vector<16x32xbf16>, vector<32x128xbf16>, vector<16x128xf32> -> vector<16x128xf32>
    %180 = arith.addf %174, %179 : vector<16x128xf32>
    %c2_146 = arith.constant 2 : index
    %c0_147 = arith.constant 0 : index
    %181 = vector.load %arg21[%c2_146, %c0_147] : memref<22x32xf32, #tpu.memory_space<vmem>>, vector<16x32xf32>
    %182 = arith.truncf %181 : vector<16x32xf32> to vector<16x32xbf16>
    %c2_148 = arith.constant 2 : index
    %c0_149 = arith.constant 0 : index
    %c0_150 = arith.constant 0 : index
    %183 = vector.load %arg14[%c2_148, %c0_149, %c0_150] : memref<7x32x128xbf16, #tpu.memory_space<vmem>>, vector<1x32x128xbf16>
    %184 = vector.shape_cast %183 : vector<1x32x128xbf16> to vector<32x128xbf16>
    %cst_151 = arith.constant dense<0.000000e+00> : vector<16x128xf32>
    %185 = tpu.matmul %182, %184, %cst_151 {dimension_numbers = #tpu.dot_dimension_numbers<[1], [0], [0], [1], [0, 0, 1, 1], [], []>} : vector<16x32xbf16>, vector<32x128xbf16>, vector<16x128xf32> -> vector<16x128xf32>
    %186 = arith.addf %180, %185 : vector<16x128xf32>
    %c3_152 = arith.constant 3 : index
    %c0_153 = arith.constant 0 : index
    %187 = vector.load %arg21[%c3_152, %c0_153] : memref<22x32xf32, #tpu.memory_space<vmem>>, vector<16x32xf32>
    %188 = arith.truncf %187 : vector<16x32xf32> to vector<16x32xbf16>
    %c3_154 = arith.constant 3 : index
    %c0_155 = arith.constant 0 : index
    %c0_156 = arith.constant 0 : index
    %189 = vector.load %arg14[%c3_154, %c0_155, %c0_156] : memref<7x32x128xbf16, #tpu.memory_space<vmem>>, vector<1x32x128xbf16>
    %190 = vector.shape_cast %189 : vector<1x32x128xbf16> to vector<32x128xbf16>
    %cst_157 = arith.constant dense<0.000000e+00> : vector<16x128xf32>
    %191 = tpu.matmul %188, %190, %cst_157 {dimension_numbers = #tpu.dot_dimension_numbers<[1], [0], [0], [1], [0, 0, 1, 1], [], []>} : vector<16x32xbf16>, vector<32x128xbf16>, vector<16x128xf32> -> vector<16x128xf32>
    %192 = arith.addf %186, %191 : vector<16x128xf32>
    %c4_158 = arith.constant 4 : index
    %c0_159 = arith.constant 0 : index
    %193 = vector.load %arg21[%c4_158, %c0_159] : memref<22x32xf32, #tpu.memory_space<vmem>>, vector<16x32xf32>
    %194 = arith.truncf %193 : vector<16x32xf32> to vector<16x32xbf16>
    %c4_160 = arith.constant 4 : index
    %c0_161 = arith.constant 0 : index
    %c0_162 = arith.constant 0 : index
    %195 = vector.load %arg14[%c4_160, %c0_161, %c0_162] : memref<7x32x128xbf16, #tpu.memory_space<vmem>>, vector<1x32x128xbf16>
    %196 = vector.shape_cast %195 : vector<1x32x128xbf16> to vector<32x128xbf16>
    %cst_163 = arith.constant dense<0.000000e+00> : vector<16x128xf32>
    %197 = tpu.matmul %194, %196, %cst_163 {dimension_numbers = #tpu.dot_dimension_numbers<[1], [0], [0], [1], [0, 0, 1, 1], [], []>} : vector<16x32xbf16>, vector<32x128xbf16>, vector<16x128xf32> -> vector<16x128xf32>
    %198 = arith.addf %192, %197 : vector<16x128xf32>
    %c5 = arith.constant 5 : index
    %c0_164 = arith.constant 0 : index
    %199 = vector.load %arg21[%c5, %c0_164] : memref<22x32xf32, #tpu.memory_space<vmem>>, vector<16x32xf32>
    %200 = arith.truncf %199 : vector<16x32xf32> to vector<16x32xbf16>
    %c5_165 = arith.constant 5 : index
    %c0_166 = arith.constant 0 : index
    %c0_167 = arith.constant 0 : index
    %201 = vector.load %arg14[%c5_165, %c0_166, %c0_167] : memref<7x32x128xbf16, #tpu.memory_space<vmem>>, vector<1x32x128xbf16>
    %202 = vector.shape_cast %201 : vector<1x32x128xbf16> to vector<32x128xbf16>
    %cst_168 = arith.constant dense<0.000000e+00> : vector<16x128xf32>
    %203 = tpu.matmul %200, %202, %cst_168 {dimension_numbers = #tpu.dot_dimension_numbers<[1], [0], [0], [1], [0, 0, 1, 1], [], []>} : vector<16x32xbf16>, vector<32x128xbf16>, vector<16x128xf32> -> vector<16x128xf32>
    %204 = arith.addf %198, %203 : vector<16x128xf32>
    %c6 = arith.constant 6 : index
    %c0_169 = arith.constant 0 : index
    %205 = vector.load %arg21[%c6, %c0_169] : memref<22x32xf32, #tpu.memory_space<vmem>>, vector<16x32xf32>
    %206 = arith.truncf %205 : vector<16x32xf32> to vector<16x32xbf16>
    %c6_170 = arith.constant 6 : index
    %c0_171 = arith.constant 0 : index
    %c0_172 = arith.constant 0 : index
    %207 = vector.load %arg14[%c6_170, %c0_171, %c0_172] : memref<7x32x128xbf16, #tpu.memory_space<vmem>>, vector<1x32x128xbf16>
    %208 = vector.shape_cast %207 : vector<1x32x128xbf16> to vector<32x128xbf16>
    %cst_173 = arith.constant dense<0.000000e+00> : vector<16x128xf32>
    %209 = tpu.matmul %206, %208, %cst_173 {dimension_numbers = #tpu.dot_dimension_numbers<[1], [0], [0], [1], [0, 0, 1, 1], [], []>} : vector<16x32xbf16>, vector<32x128xbf16>, vector<16x128xf32> -> vector<16x128xf32>
    %210 = arith.addf %204, %209 : vector<16x128xf32>
    %c0_174 = arith.constant 0 : index
    %c0_175 = arith.constant 0 : index
    %211 = vector.load %arg15[%c0_174, %c0_175] : memref<1x128xf32, #tpu.memory_space<vmem>>, vector<1x128xf32>
    %212 = vector.broadcast %211 : vector<1x128xf32> to vector<16x128xf32>
    %213 = arith.addf %210, %212 : vector<16x128xf32>
    %cst_176 = arith.constant 0.000000e+00 : f32
    %214 = vector.broadcast %cst_176 : f32 to vector<16x128xf32>
    %215 = arith.subf %214, %213 : vector<16x128xf32>
    %216 = math.exp %215 : vector<16x128xf32>
    %cst_177 = arith.constant 1.000000e+00 : f32
    %217 = vector.broadcast %cst_177 : f32 to vector<16x128xf32>
    %218 = arith.addf %217, %216 : vector<16x128xf32>
    %cst_178 = arith.constant 1.000000e+00 : f32
    %219 = vector.broadcast %cst_178 : f32 to vector<16x128xf32>
    %220 = arith.divf %219, %218 : vector<16x128xf32>
    %221 = arith.mulf %136, %220 : vector<16x128xf32>
    %222 = arith.addf %221, %128 : vector<16x128xf32>
    %c0_179 = arith.constant 0 : index
    %c0_180 = arith.constant 0 : index
    %c0_181 = arith.constant 0 : index
    %223 = vector.load %arg16[%c0_179, %c0_180, %c0_181] : memref<1x16x128xf32, #tpu.memory_space<vmem>>, vector<1x16x128xf32>
    %224 = vector.shape_cast %223 : vector<1x16x128xf32> to vector<16x128xf32>
    %225 = vector.shape_cast %222 : vector<16x128xf32> to vector<1x16x128xf32>
    tpu.vector_store %arg16[%c0_179, %c0_180, %c0_181], %225 {strides = array<i32>} : memref<1x16x128xf32, #tpu.memory_space<vmem>>, vector<1x16x128xf32>,
    return
  }
  func.func @transform_0(%arg0: i32) -> (i32, i32, i32) {
    %c0_i32 = arith.constant 0 : i32
    %c0_i32_0 = arith.constant 0 : i32
    %c0_i32_1 = arith.constant 0 : i32
    return %arg0, %c0_i32, %c0_i32_0 : i32, i32, i32
  }
  func.func @transform_1(%arg0: i32) -> (i32, i32) {
    %c0_i32 = arith.constant 0 : i32
    %c0_i32_0 = arith.constant 0 : i32
    %c0_i32_1 = arith.constant 0 : i32
    return %c0_i32, %c0_i32_0 : i32, i32
  }
  func.func @transform_2(%arg0: i32) -> (i32, i32) {
    %c0_i32 = arith.constant 0 : i32
    %c0_i32_0 = arith.constant 0 : i32
    %c0_i32_1 = arith.constant 0 : i32
    return %c0_i32, %c0_i32_0 : i32, i32
  }
  func.func @transform_3(%arg0: i32) -> (i32, i32, i32) {
    %c0_i32 = arith.constant 0 : i32
    %c0_i32_0 = arith.constant 0 : i32
    %c0_i32_1 = arith.constant 0 : i32
    %c0_i32_2 = arith.constant 0 : i32
    return %c0_i32, %c0_i32_0, %c0_i32_1 : i32, i32, i32
  }
  func.func @transform_4(%arg0: i32) -> (i32, i32) {
    %c0_i32 = arith.constant 0 : i32
    %c0_i32_0 = arith.constant 0 : i32
    %c0_i32_1 = arith.constant 0 : i32
    return %c0_i32, %c0_i32_0 : i32, i32
  }
  func.func @transform_5(%arg0: i32) -> (i32, i32, i32) {
    %c0_i32 = arith.constant 0 : i32
    %c0_i32_0 = arith.constant 0 : i32
    %c0_i32_1 = arith.constant 0 : i32
    %c0_i32_2 = arith.constant 0 : i32
    return %c0_i32, %c0_i32_0, %c0_i32_1 : i32, i32, i32
  }
  func.func @transform_6(%arg0: i32) -> (i32, i32) {
    %c0_i32 = arith.constant 0 : i32
    %c0_i32_0 = arith.constant 0 : i32
    %c0_i32_1 = arith.constant 0 : i32
    return %c0_i32, %c0_i32_0 : i32, i32
  }
  func.func @transform_7(%arg0: i32) -> (i32, i32, i32) {
    %c0_i32 = arith.constant 0 : i32
    %c0_i32_0 = arith.constant 0 : i32
    %c0_i32_1 = arith.constant 0 : i32
    %c0_i32_2 = arith.constant 0 : i32
    return %c0_i32, %c0_i32_0, %c0_i32_1 : i32, i32, i32
  }
  func.func @transform_8(%arg0: i32) -> (i32, i32) {
    %c0_i32 = arith.constant 0 : i32
    %c0_i32_0 = arith.constant 0 : i32
    %c0_i32_1 = arith.constant 0 : i32
    return %c0_i32, %c0_i32_0 : i32, i32
  }
  func.func @transform_9(%arg0: i32) -> (i32, i32, i32) {
    %c0_i32 = arith.constant 0 : i32
    %c0_i32_0 = arith.constant 0 : i32
    %c0_i32_1 = arith.constant 0 : i32
    %c0_i32_2 = arith.constant 0 : i32
    return %c0_i32, %c0_i32_0, %c0_i32_1 : i32, i32, i32
  }
  func.func @transform_10(%arg0: i32) -> (i32, i32) {
    %c0_i32 = arith.constant 0 : i32
    %c0_i32_0 = arith.constant 0 : i32
    %c0_i32_1 = arith.constant 0 : i32
    return %c0_i32, %c0_i32_0 : i32, i32
  }
  func.func @transform_11(%arg0: i32) -> (i32, i32) {
    %c0_i32 = arith.constant 0 : i32
    %c0_i32_0 = arith.constant 0 : i32
    %c0_i32_1 = arith.constant 0 : i32
    return %c0_i32, %c0_i32_0 : i32, i32
  }
  func.func @transform_12(%arg0: i32) -> (i32, i32) {
    %c0_i32 = arith.constant 0 : i32
    %c0_i32_0 = arith.constant 0 : i32
    %c0_i32_1 = arith.constant 0 : i32
    return %c0_i32, %c0_i32_0 : i32, i32
  }
  func.func @transform_13(%arg0: i32) -> (i32, i32, i32) {
    %c0_i32 = arith.constant 0 : i32
    %c0_i32_0 = arith.constant 0 : i32
    %c0_i32_1 = arith.constant 0 : i32
    %c0_i32_2 = arith.constant 0 : i32
    return %c0_i32, %c0_i32_0, %c0_i32_1 : i32, i32, i32
  }
  func.func @transform_14(%arg0: i32) -> (i32, i32) {
    %c0_i32 = arith.constant 0 : i32
    %c0_i32_0 = arith.constant 0 : i32
    %c0_i32_1 = arith.constant 0 : i32
    return %c0_i32, %c0_i32_0 : i32, i32
  }
  func.func @transform_15(%arg0: i32) -> (i32, i32, i32) {
    %c0_i32 = arith.constant 0 : i32
    %c0_i32_0 = arith.constant 0 : i32
    %c0_i32_1 = arith.constant 0 : i32
    return %arg0, %c0_i32, %c0_i32_0 : i32, i32, i32
  }
}

</mosaic_0001>

<bundles_post_ra>
// kernel: dsam_add1_forward.1
= control target key start
LH: loop header
LB: loop body
LE: loop exit
PB: predicated region body
PF: predicated region fallthrough
CT: control target
= control target key end

     0   :  { %s3861_s18 = smov 0   ;;  %s4555_s0 = inlined_call_operand.vmem [shape: bf16[2,16,256], index: 0, kind: input, shape index: {}]   ;;  %s4556_s1 = inlined_call_operand.vmem [shape: bf16[256,128], index: 1, kind: input, shape index: {}]   ;;  %s4557_s2 = inlined_call_operand.vmem [shape: f32[1,128], index: 2, kind: input, shape index: {}]   ;;  %s4558_s3 = inlined_call_operand.vmem [shape: bf16[3,128,128], index: 3, kind: input, shape index: {}]   ;;  %s4559_s4 = inlined_call_operand.vmem [shape: f32[1,128], index: 4, kind: input, shape index: {}]   ;;  %s4560_s5 = inlined_call_operand.vmem [shape: bf16[3,128,128], index: 5, kind: input, shape index: {}]   ;;  %s4561_s6 = inlined_call_operand.vmem [shape: f32[1,128], index: 6, kind: input, shape index: {}]   ;;  %s4562_s7 = inlined_call_operand.vmem [shape: bf16[3,128,128], index: 7, kind: input, shape index: {}]   ;;  %s4563_s8 = inlined_call_operand.vmem [shape: f32[1,128], index: 8, kind: input, shape index: {}]   ;;  %s4564_s9 = inlined_call_operand.vmem [shape: bf16[3,128,128], index: 9, kind: input, shape index: {}]   ;;  %s4565_s10 = inlined_call_operand.vmem [shape: f32[1,128], index: 10, kind: input, shape index: {}]   ;;  %s4566_s11 = inlined_call_operand.vmem [shape: bf16[128,128], index: 11, kind: input, shape index: {}]   ;;  %s4567_s12 = inlined_call_operand.vmem [shape: f32[1,128], index: 12, kind: input, shape index: {}]   ;;  %s4568_s13 = inlined_call_operand.vmem [shape: bf16[7,32,128], index: 13, kind: input, shape index: {}]   ;;  %s4569_s14 = inlined_call_operand.vmem [shape: f32[1,128], index: 14, kind: input, shape index: {}]   ;;  %s4570_s15 = inlined_call_operand.vmem [shape: f32[2,16,128], index: 15, kind: output, shape index: {}]  }
   0x1 LB: > { %s2811_s19 = sadd.s32 4294967295, %s3770_s18   ;;  %p2815_p0 = scmp.ge.s32.totalorder %s3770_s18, 1  ;;  %s3770_s18 = sphi %s3861_s18, %s25_s18  }
   0x2   : > { %p437_p1 = scmp.lt.s32.totalorder %s3770_s18, 3 }
   0x4   : > { %p438_p2 = pnand %p2815_p0, %p437_p1 }
   0x5   : > { %v3619_v0 = vld [vmem:[%s4556_s1 + $0x40] sm:$0xff] (!%p438_p2)   ;;  %v3621_v2 = vld [vmem:[%s4556_s1 + $0x48] sm:$0xff] (!%p438_p2)   ;;  %v3772_v3 = vmov (!%p438_p2), 0.0   ;;  %p485_p3 = scmp.lt.s32.totalorder (!%p438_p2), %s2811_s19, 1  ;;  %v3623_v5 = vld [vmem:[%s4556_s1 + $0x50] sm:$0xff] (!%p438_p2)   ;;  %vm3773_vm0 = vmmov (!%p438_p2), 0  }
   0x6   : > { %441 = sbr.rel (%p438_p2) target bundleno = 2040 (0x7f8), region = 80  ;;  %v3620_v1 = vld [vmem:[%s4556_s1] sm:$0xff] (!%p438_p2)   ;;  %3126 = vmatprep.subr.bf16.mxu0 (!%p438_p2), %v3619_v0  ;;  %3286 = vmatprep.subr.bf16.mxu1 (!%p438_p2), %v3772_v3  ;;  %686 = vst [vmem:[#allocation2] sm:$0x1] (!%p438_p2), %v3772_v3  ;;  %689 = vst [vmem:[#allocation2 + $0x11] sm:$0x1] (!%p438_p2), %v3772_v3 }
   0x7   : > { %1029 = vst [vmem:[#allocation3] sm:$0x3] (!%p438_p2), %v3772_v3  ;;  %1032 = vst [vmem:[#allocation3 + $0x12] sm:$0x3] (!%p438_p2), %v3772_v3  ;;  %3127 = vmatpush3.bf16.msra.mxu0 (!%p438_p2), %v3620_v1  ;;  %v3622_v4 = vld [vmem:[%s4556_s1 + $0x8] sm:$0xff] (!%p438_p2)   ;;  %v3624_v6 = vld [vmem:[%s4556_s1 + $0x10] sm:$0xff] (!%p438_p2)   ;;  %3302 = vmatprep.mubr.msk.bf16.mxu1 (!%p438_p2), %vm3773_vm0, %v3772_v3 }
   0x8   : > { %1372 = vst [vmem:[#allocation4] sm:$0xf] (!%p438_p2), %v3772_v3  ;;  %1375 = vst [vmem:[#allocation4 + $0x14] sm:$0xf] (!%p438_p2), %v3772_v3  ;;  %3128 = vmatprep.subr.bf16.mxu0 (!%p438_p2), %v3621_v2  ;;  %v3625_v7 = vld [vmem:[%s4556_s1 + $0x58] sm:$0xff] (!%p438_p2)   ;;  %v3627_v9 = vld [vmem:[%s4556_s1 + $0x60] sm:$0xff] (!%p438_p2)  }
   0x9   : > { %v3626_v8 = vld [vmem:[%s4556_s1 + $0x18] sm:$0xff] (!%p438_p2)   ;;  %v3628_v10 = vld [vmem:[%s4556_s1 + $0x20] sm:$0xff] (!%p438_p2)   ;;  %v3629_v11 = vld [vmem:[%s4556_s1 + $0x68] sm:$0xff] (!%p438_p2)   ;;  %s3774_s24 = smov (!%p438_p2), 96   ;;  %s3775_s25 = smov (!%p438_p2), 112   ;;  %vm2254_vm1 = vcmask (!%p438_p2), 256000  }
   0xa   : > { %v3630_v12 = vld [vmem:[%s4556_s1 + $0x28] sm:$0xff] (!%p438_p2)   ;;  %v3638_v14 = vld [vmem:[%s4558_s3 + $0x40] sm:$0xff] (!%p438_p2)   ;;  %v3631_v15 = vld [vmem:[%s4556_s1 + $0x70] sm:$0xff] (!%p438_p2)   ;;  %s3776_s26 = smov (!%p438_p2), 80   ;;  %s3777_s27 = smov (!%p438_p2), 64   ;;  %vm2256_vm2 = vcmask (!%p438_p2), 130048  }
   0xb   : > { %3129 = vmatpush3.bf16.msra.mxu0 (!%p438_p2), %v3622_v4  ;;  %3287 = vmatpush3.bf16.msra.mxu1 (!%p438_p2), %v3638_v14  ;;  %v3640_v16 = vld [vmem:[%s4558_s3 + $0x48] sm:$0xff] (!%p438_p2)   ;;  %v3632_v17 = vld [vmem:[%s4556_s1 + $0x30] sm:$0xff] (!%p438_p2)   ;;  %v3633_v18 = vld [vmem:[%s4556_s1 + $0x78] sm:$0xff] (!%p438_p2)   ;;  %s3778_s29 = smov (!%p438_p2), 48   ;;  %s3779_s30 = smov (!%p438_p2), 32   ;;  %vm2267_vm3 = vcmask (!%p438_p2), 261248  }
   0xc   : > { %3130 = vmatprep.subr.bf16.mxu0 (!%p438_p2), %v3623_v5  ;;  %3288 = vmatprep.subr.bf16.mxu1 (!%p438_p2), %v3772_v3  ;;  %v3642_v19 = vld [vmem:[%s4558_s3 + $0x50] sm:$0xff] (!%p438_p2)   ;;  %v3634_v20 = vld [vmem:[%s4556_s1 + $0x38] sm:$0xff] (!%p438_p2)   ;;  %v3639_v22 = vld [vmem:[%s4558_s3] sm:$0xff] (!%p438_p2)   ;;  %s3780_s16 = smov (!%p438_p2), 16   ;;  %2255 = vst.msk [vmem:[#allocation6] sm:$0x7] (!%p438_p2), %vm2254_vm1, %v3772_v3 }
   0xd   : > { %s4572_s19 = smov (!%p485_p3, %s2811_s19), 1  ;;  %v3641_v23 = vld [vmem:[%s4558_s3 + $0x8] sm:$0xff]   ;;  %v3643_v24 = vld [vmem:[%s4558_s3 + $0x10] sm:$0xff]   ;;  %v3644_v25 = vld [vmem:[%s4558_s3 + $0x58] sm:$0xff]   ;;  %2270 = vst.msk [vmem:[#allocation6 + $0x13] sm:$0x7] %vm2254_vm1, %v3772_v3 }
   0xe   : > { %s3124_s23 = sshll.u32 %s4572_s19, 4  ;;  %v3646_v26 = vld [vmem:[%s4558_s3 + $0x60] sm:$0xff]   ;;  %v3648_v27 = vld [vmem:[%s4558_s3 + $0x68] sm:$0xff]   ;;  %v3645_v28 = vld [vmem:[%s4558_s3 + $0x18] sm:$0xff]   ;;  %vm2298_vm4 = vcmask 261120  }
   0xf   : > { %3131 = vmatpush3.bf16.msra.mxu0 %v3624_v6  ;;  %s489_s28 = scalar_lea.vmem %s4555_s0, %s3124_s23  ;;  %3289 = vmatpush3.bf16.msra.mxu1 %v3640_v16  ;;  %v3650_v29 = vld [vmem:[%s4558_s3 + $0x70] sm:$0xff]   ;;  %v3647_v30 = vld [vmem:[%s4558_s3 + $0x20] sm:$0xff]   ;;  %v3652_v31 = vld [vmem:[%s4558_s3 + $0x78] sm:$0xff]  }
  0x10   : > { %3132 = vmatprep.subr.bf16.mxu0 %v3625_v7  ;;  %v3637_v13 = vld [vmem:[%s489_s28 + $0x4] ss:$8 sps:$4 sm:$0xff]   ;;  %3290 = vmatprep.subr.bf16.mxu1 %v3772_v3  ;;  %v3635_v21 = vld [vmem:[%s489_s28] ss:$8 sps:$4 sm:$0xff]   ;;  %v3651_v33 = vld [vmem:[%s4558_s3 + $0x30] sm:$0xff]  }
  0x11   : > { %675 = vmatprep.mubr.bf16.mxu0 %v3637_v13  ;;  %v3649_v32 = vld [vmem:[%s4558_s3 + $0x28] sm:$0xff]   ;;  %v3653_v34 = vld [vmem:[%s4558_s3 + $0x38] sm:$0xff]   ;;  %v2820_v36 = vld [vmem:[%s4557_s2] ss:$0 sm:$0xff] }
  0x12   : > { %v3654_v46 = vld [vmem:[%s4558_s3 + $0x80] sm:$0xff]   ;;  %v3655_v48 = vld [vmem:[%s4558_s3 + $0x88] sm:$0xff]   ;;  %v3656_v51 = vld [vmem:[%s4558_s3 + $0x90] sm:$0xff]  }
  0x13   : > { %3133 = vmatpush3.bf16.msra.mxu0 %v3626_v8  ;;  %3291 = vmatpush3.bf16.msra.mxu1 %v3642_v19  ;;  %v3657_v53 = vld [vmem:[%s4558_s3 + $0x98] sm:$0xff]   ;;  %v3658_v54 = vld [vmem:[%s4558_s3 + $0xa0] sm:$0xff]   ;;  %v3659_v55 = vld [vmem:[%s4558_s3 + $0xa8] sm:$0xff]  }
  0x14   : > { %3134 = vmatprep.subr.bf16.mxu0 %v3627_v9  ;;  %3292 = vmatprep.subr.bf16.mxu1 %v3772_v3  ;;  %v3660_v56 = vld [vmem:[%s4558_s3 + $0xb0] sm:$0xff]   ;;  %v3661_v57 = vld [vmem:[%s4558_s3 + $0xb8] sm:$0xff]   ;;  %v3662_v61 = vld [vmem:[%s4560_s5 + $0x40] sm:$0xff]  }
  0x15   : > { %v3663_v62 = vld [vmem:[%s4560_s5] sm:$0xff]   ;;  %v3664_v63 = vld [vmem:[%s4560_s5 + $0x48] sm:$0xff]   ;;  %v3666_v1 = vld [vmem:[%s4560_s5 + $0x50] sm:$0xff]  }
  0x16   : > { %v3665_v0 = vld [vmem:[%s4560_s5 + $0x8] sm:$0xff]   ;;  %v3667_v2 = vld [vmem:[%s4560_s5 + $0x10] sm:$0xff]   ;;  %v3668_v4 = vld [vmem:[%s4560_s5 + $0x58] sm:$0xff]  }
  0x17   : > { %3135 = vmatpush3.bf16.msra.mxu0 %v3628_v10  ;;  %3293 = vmatpush3.bf16.msra.mxu1 %v3644_v25  ;;  %v3670_v5 = vld [vmem:[%s4560_s5 + $0x60] sm:$0xff]   ;;  %v3672_v6 = vld [vmem:[%s4560_s5 + $0x68] sm:$0xff]   ;;  %v3669_v7 = vld [vmem:[%s4560_s5 + $0x18] sm:$0xff]  }
  0x18   : > { %3136 = vmatprep.subr.bf16.mxu0 %v3629_v11  ;;  %3294 = vmatprep.subr.bf16.mxu1 %v3772_v3  ;;  %v3674_v8 = vld [vmem:[%s4560_s5 + $0x70] sm:$0xff]   ;;  %v3671_v9 = vld [vmem:[%s4560_s5 + $0x20] sm:$0xff]   ;;  %v3676_v10 = vld [vmem:[%s4560_s5 + $0x78] sm:$0xff]  }
  0x19   : > { %v3673_v11 = vld [vmem:[%s4560_s5 + $0x28] sm:$0xff]   ;;  %v3677_v13 = vld [vmem:[%s4560_s5 + $0x38] sm:$0xff]   ;;  %v2895_v25 = vld [vmem:[%s4559_s4] ss:$0 sm:$0xff] }
  0x1b   : > { %3137 = vmatpush3.bf16.msra.mxu0 %v3630_v12  ;;  %3295 = vmatpush3.bf16.msra.mxu1 %v3646_v26  ;;  %v3675_v12 = vld [vmem:[%s4560_s5 + $0x30] sm:$0xff]  }
  0x1c   : > { %3138 = vmatprep.subr.bf16.mxu0 %v3631_v15  ;;  %3296 = vmatprep.subr.bf16.mxu1 %v3772_v3 }
  0x1f   : > { %3139 = vmatpush3.bf16.msra.mxu0 %v3632_v17  ;;  %3297 = vmatpush3.bf16.msra.mxu1 %v3648_v27 }
  0x20   : > { %3140 = vmatprep.subr.bf16.mxu0 %v3633_v18  ;;  %3298 = vmatprep.subr.bf16.mxu1 %v3772_v3 }
  0x23   : > { %3141 = vmatpush3.bf16.msra.mxu0 %v3634_v20  ;;  %3299 = vmatpush3.bf16.msra.mxu1 %v3650_v29 }
  0x24   : > { %3306 = vmatprep.subr.bf16.mxu0 %v3772_v3  ;;  %3300 = vmatprep.subr.bf16.mxu1 %v3772_v3 }
  0x26   : > { %676 = vmatmul.mubr.bf16.vlgmr.msra.gmra.mrb[0].mxu0 %v3635_v21 }
  0x27   : > { %3307 = vmatpush3.bf16.msra.mxu0 %v3639_v22  ;;  %3301 = vmatpush3.bf16.msra.mxu1 %v3652_v31 }
  0x28   : > { %3308 = vmatprep.subr.bf16.mxu0 %v3772_v3  ;;  %3326 = vmatprep.subr.bf16.mxu1 %v3772_v3 }
  0x29   : > { %3322 = vmatprep.mubr.msk.bf16.mxu0 %vm3773_vm0, %v3772_v3 }
  0x2b   : > { %3309 = vmatpush3.bf16.msra.mxu0 %v3641_v23 }
  0x2c   : > { %3310 = vmatprep.subr.bf16.mxu0 %v3772_v3 }
  0x2f   : > { %3311 = vmatpush3.bf16.msra.mxu0 %v3643_v24 }
  0x30   : > { %3312 = vmatprep.subr.bf16.mxu0 %v3772_v3 }
  0x33   : > { %3313 = vmatpush3.bf16.msra.mxu0 %v3645_v28 }
  0x34   : > { %3314 = vmatprep.subr.bf16.mxu0 %v3772_v3 }
  0x37   : > { %3315 = vmatpush3.bf16.msra.mxu0 %v3647_v30 }
  0x38   : > { %3316 = vmatprep.subr.bf16.mxu0 %v3772_v3 }
  0x3b   : > { %3317 = vmatpush3.bf16.msra.mxu0 %v3649_v32 }
  0x3c   : > { %3318 = vmatprep.subr.bf16.mxu0 %v3772_v3 }
  0x3f   : > { %3319 = vmatpush3.bf16.msra.mxu0 %v3651_v33 }
  0x40   : > { %3320 = vmatprep.subr.bf16.mxu0 %v3772_v3 }
  0x43   : > { %3321 = vmatpush3.bf16.msra.mxu0 %v3653_v34 }
  0x44   : > { %3346 = vmatprep.subr.bf16.mxu0 %v3772_v3 }
  0xf9   : > { %v3142_v35 = vpop.f32.mrb[0].mxu0 }
  0xfa   : > { %v3143_v37 = vpop.f32.mrb[1].mxu0 }
  0xfb   : > { %v3144_v38 = vadd.f32 %v3143_v37, %v3142_v35  ;;  %v3145_v39 = vpop.f32.mrb[2].mxu0  ;;  %v3678_v35 = vld [vmem:[%s4560_s5 + $0x80] sm:$0xff]   ;;  %v3679_v37 = vld [vmem:[%s4560_s5 + $0x88] sm:$0xff]  }
  0xfc   : > { %v3146_v40 = vpop.f32.mrb[3].mxu0 }
  0xfd   : > { %v678_v41 = vadd.f32 %v3144_v38, %v2820_v36  ;;  %v3147_v42 = vadd.f32 %v3146_v40, %v3145_v39  ;;  %v3680_v40 = vld [vmem:[%s4560_s5 + $0x90] sm:$0xff]  }
  0xff   : > { %v4004_v43 = vmax.f32 %v678_v41, 0.0  ;;  %v681_v44 = vadd.f32 %v3147_v42, %v2820_v36  ;;  %v3681_v42 = vld [vmem:[%s4560_s5 + $0x98] sm:$0xff]  }
 0x101   : > { %687 = vst [vmem:[#allocation2 + $0x1] sm:$0xff] %v4004_v43  ;;  %v4007_v45 = vmax.f32 %v681_v44, 0.0  ;;  %v3682_v44 = vld [vmem:[%s4560_s5 + $0xa0] sm:$0xff]  }
 0x103   : > { %688 = vst [vmem:[#allocation2 + $0x9] sm:$0xff] %v4007_v45  ;;  %v711_v47 = vpack.c.bf16 %v4007_v45, %v4004_v43 }
 0x105   : > { %3303 = vmatmul.mubr.bf16.vlgmr.msra.gmra.mrb[0].mxu1 %v711_v47  ;;  %v3684_v47 = vld [vmem:[%s4560_s5 + $0xb0] sm:$0xff]  }
 0x106   : > { %3327 = vmatpush3.bf16.msra.mxu1 %v3654_v46  ;;  %3342 = vmatprep.mubr.msk.bf16.mxu1 %vm3773_vm0, %v3772_v3  ;;  %v3683_v46 = vld [vmem:[%s4560_s5 + $0xa8] sm:$0xff]  }
 0x107   : > { %3328 = vmatprep.subr.bf16.mxu1 %v3772_v3 }
 0x108   : > { %v690_v49 = vld [vmem:[#allocation2] sm:$0xff] }
 0x10a   : > { %v691_v50 = vld [vmem:[#allocation2 + $0x8] sm:$0xff]  ;;  %3329 = vmatpush3.bf16.msra.mxu1 %v3655_v48  ;;  %v3685_v48 = vld [vmem:[%s4560_s5 + $0xb8] sm:$0xff]  }
 0x10b   : > { %v692_v52 = vpack.c.bf16 %v691_v50, %v690_v49  ;;  %3330 = vmatprep.subr.bf16.mxu1 %v3772_v3  ;;  %v907_v58 = vld [vmem:[#allocation2 + $0x2] sm:$0xff]  ;;  %v908_v59 = vld [vmem:[#allocation2 + $0xa] sm:$0xff] }
 0x10c   : > { %v909_v60 = vpack.c.bf16 %v908_v59, %v907_v58  ;;  %v3692_v58 = vld [vmem:[%s4562_s7 + $0x58] sm:$0xff]   ;;  %v3694_v59 = vld [vmem:[%s4562_s7 + $0x60] sm:$0xff]  }
 0x10d   : > { %3323 = vmatmul.mubr.bf16.vlgmr.msra.gmra.mrb[4].mxu0 %v692_v52  ;;  %v3686_v52 = vld [vmem:[%s4562_s7 + $0x40] sm:$0xff]  }
 0x10e   : > { %3331 = vmatpush3.bf16.msra.mxu1 %v3656_v51  ;;  %3362 = vmatprep.mubr.msk.bf16.mxu0 %vm3773_vm0, %v3772_v3 }
 0x10f   : > { %3332 = vmatprep.subr.bf16.mxu1 %v3772_v3  ;;  %3347 = vmatpush3.bf16.msra.mxu0 %v3662_v61  ;;  %v3693_v61 = vld [vmem:[%s4562_s7 + $0x18] sm:$0xff]  }
 0x110   : > { %3348 = vmatprep.subr.bf16.mxu0 %v3772_v3 }
 0x112   : > { %3333 = vmatpush3.bf16.msra.mxu1 %v3657_v53  ;;  %v3687_v53 = vld [vmem:[%s4562_s7] sm:$0xff]  }
 0x113   : > { %3334 = vmatprep.subr.bf16.mxu1 %v3772_v3  ;;  %3349 = vmatpush3.bf16.msra.mxu0 %v3664_v63  ;;  %v3695_v63 = vld [vmem:[%s4562_s7 + $0x20] sm:$0xff]  }
 0x114   : > { %3350 = vmatprep.subr.bf16.mxu0 %v3772_v3 }
 0x116   : > { %3335 = vmatpush3.bf16.msra.mxu1 %v3658_v54  ;;  %v3688_v54 = vld [vmem:[%s4562_s7 + $0x48] sm:$0xff]  }
 0x117   : > { %3336 = vmatprep.subr.bf16.mxu1 %v3772_v3  ;;  %3351 = vmatpush3.bf16.msra.mxu0 %v3666_v1  ;;  %v3697_v1 = vld [vmem:[%s4562_s7 + $0x28] sm:$0xff]  }
 0x118   : > { %3352 = vmatprep.subr.bf16.mxu0 %v3772_v3 }
 0x11a   : > { %3337 = vmatpush3.bf16.msra.mxu1 %v3659_v55  ;;  %v3689_v55 = vld [vmem:[%s4562_s7 + $0x8] sm:$0xff]  }
 0x11b   : > { %3338 = vmatprep.subr.bf16.mxu1 %v3772_v3  ;;  %3353 = vmatpush3.bf16.msra.mxu0 %v3668_v4  ;;  %v3701_v4 = vld [vmem:[%s4562_s7 + $0x38] sm:$0xff]  }
 0x11c   : > { %3354 = vmatprep.subr.bf16.mxu0 %v3772_v3 }
 0x11e   : > { %3339 = vmatpush3.bf16.msra.mxu1 %v3660_v56  ;;  %v3690_v56 = vld [vmem:[%s4562_s7 + $0x50] sm:$0xff]  }
 0x11f   : > { %3340 = vmatprep.subr.bf16.mxu1 %v3772_v3  ;;  %3355 = vmatpush3.bf16.msra.mxu0 %v3670_v5 }
 0x120   : > { %3356 = vmatprep.subr.bf16.mxu0 %v3772_v3 }
 0x122   : > { %3341 = vmatpush3.bf16.msra.mxu1 %v3661_v57  ;;  %v3691_v57 = vld [vmem:[%s4562_s7 + $0x10] sm:$0xff]  }
 0x123   : > { %3366 = vmatprep.subr.bf16.mxu1 %v3772_v3  ;;  %3357 = vmatpush3.bf16.msra.mxu0 %v3672_v6 }
 0x124   : > { %3358 = vmatprep.subr.bf16.mxu0 %v3772_v3 }
 0x125   : > { %3343 = vmatmul.mubr.bf16.vlgmr.msra.gmra.mrb[4].mxu1 %v909_v60  ;;  %v3696_v60 = vld [vmem:[%s4562_s7 + $0x68] sm:$0xff]  }
 0x126   : > { %3382 = vmatprep.mubr.msk.bf16.mxu1 %vm3773_vm0, %v3772_v3  ;;  %3367 = vmatpush3.bf16.msra.mxu1 %v3663_v62  ;;  %v3698_v62 = vld [vmem:[%s4562_s7 + $0x70] sm:$0xff]  }
 0x127   : > { %3368 = vmatprep.subr.bf16.mxu1 %v3772_v3  ;;  %3359 = vmatpush3.bf16.msra.mxu0 %v3674_v8 }
 0x128   : > { %3360 = vmatprep.subr.bf16.mxu0 %v3772_v3 }
 0x12a   : > { %3369 = vmatpush3.bf16.msra.mxu1 %v3665_v0  ;;  %v3700_v0 = vld [vmem:[%s4562_s7 + $0x78] sm:$0xff]  }
 0x12b   : > { %3370 = vmatprep.subr.bf16.mxu1 %v3772_v3  ;;  %3361 = vmatpush3.bf16.msra.mxu0 %v3676_v10 }
 0x12c   : > { %3386 = vmatprep.subr.bf16.mxu0 %v3772_v3 }
 0x12e   : > { %3371 = vmatpush3.bf16.msra.mxu1 %v3667_v2  ;;  %v3699_v2 = vld [vmem:[%s4562_s7 + $0x30] sm:$0xff]  }
 0x12f   : > { %3372 = vmatprep.subr.bf16.mxu1 %v3772_v3 }
 0x132   : > { %3373 = vmatpush3.bf16.msra.mxu1 %v3669_v7 }
 0x133   : > { %3374 = vmatprep.subr.bf16.mxu1 %v3772_v3 }
 0x136   : > { %3375 = vmatpush3.bf16.msra.mxu1 %v3671_v9 }
 0x137   : > { %3376 = vmatprep.subr.bf16.mxu1 %v3772_v3 }
 0x13a   : > { %3377 = vmatpush3.bf16.msra.mxu1 %v3673_v11 }
 0x13b   : > { %3378 = vmatprep.subr.bf16.mxu1 %v3772_v3 }
 0x13e   : > { %3379 = vmatpush3.bf16.msra.mxu1 %v3675_v12 }
 0x13f   : > { %3380 = vmatprep.subr.bf16.mxu1 %v3772_v3 }
 0x142   : > { %3381 = vmatpush3.bf16.msra.mxu1 %v3677_v13 }
 0x143   : > { %3406 = vmatprep.subr.bf16.mxu1 %v3772_v3 }
 0x1d8   : > { %v811_v14 = vpop.f32.mrb[0].mxu1 }
 0x1d9   : > { %v3304_v15 = vpop.f32.mrb[1].mxu1 }
 0x1da   : > { %v814_v16 = vpop.f32.mrb[2].mxu1 }
 0x1db   : > { %v3305_v17 = vpop.f32.mrb[3].mxu1 }
 0x1e0   : > { %v900_v18 = vpop.f32.mrb[4].mxu0 }
 0x1e1   : > { %v901_v19 = vadd.f32 %v900_v18, %v811_v14  ;;  %v3324_v20 = vpop.f32.mrb[5].mxu0 }
 0x1e2   : > { %v903_v21 = vpop.f32.mrb[6].mxu0 }
 0x1e3   : > { %v904_v22 = vadd.f32 %v903_v21, %v814_v16  ;;  %v3325_v23 = vpop.f32.mrb[7].mxu0  ;;  %v2952_v16 = vld [vmem:[%s4561_s6] ss:$0 sm:$0xff] }
 0x1f8   : > { %v1009_v24 = vpop.f32.mrb[4].mxu1 }
 0x1f9   : > { %v1016_v26 = vadd.f32 %v1009_v24, %v901_v19  ;;  %v3344_v27 = vpop.f32.mrb[5].mxu1 }
 0x1fa   : > { %v1012_v28 = vpop.f32.mrb[6].mxu1 }
 0x1fb   : > { %v1025_v29 = vadd.f32 %v2895_v25, %v1016_v26  ;;  %v1017_v30 = vadd.f32 %v1012_v28, %v904_v22  ;;  %v3345_v31 = vpop.f32.mrb[7].mxu1  ;;  %v3702_v26 = vld [vmem:[%s4562_s7 + $0x80] sm:$0xff]   ;;  %v3703_v28 = vld [vmem:[%s4562_s7 + $0x88] sm:$0xff]  }
 0x1fc   : > { %v3704_v31 = vld [vmem:[%s4562_s7 + $0x90] sm:$0xff]  }
 0x1fd   : > { %v4117_v32 = vmax.f32 %v1025_v29, 0.0  ;;  %v1026_v33 = vadd.f32 %v2895_v25, %v1017_v30 }
 0x1ff   : > { %1030 = vst [vmem:[#allocation3 + $0x2] sm:$0xff] %v4117_v32  ;;  %v4120_v34 = vmax.f32 %v1026_v33, 0.0 }
 0x201   : > { %1031 = vst [vmem:[#allocation3 + $0xa] sm:$0xff] %v4120_v34  ;;  %v1054_v36 = vpack.c.bf16 %v4120_v34, %v4117_v32 }
 0x203   : > { %3363 = vmatmul.mubr.bf16.vlgmr.msra.gmra.mrb[8].mxu0 %v1054_v36  ;;  %v3706_v36 = vld [vmem:[%s4562_s7 + $0xa0] sm:$0xff]  }
 0x204   : > { %3387 = vmatpush3.bf16.msra.mxu0 %v3678_v35  ;;  %3402 = vmatprep.mubr.msk.bf16.mxu0 %vm3773_vm0, %v3772_v3  ;;  %v3705_v35 = vld [vmem:[%s4562_s7 + $0x98] sm:$0xff]  }
 0x205   : > { %3388 = vmatprep.subr.bf16.mxu0 %v3772_v3 }
 0x206   : > { %v1033_v38 = vld [vmem:[#allocation3] sm:$0xff] }
 0x208   : > { %v1034_v39 = vld [vmem:[#allocation3 + $0x8] sm:$0xff]  ;;  %3389 = vmatpush3.bf16.msra.mxu0 %v3679_v37  ;;  %v3707_v37 = vld [vmem:[%s4562_s7 + $0xa8] sm:$0xff]  }
 0x209   : > { %v1035_v41 = vpack.c.bf16 %v1034_v39, %v1033_v38  ;;  %3390 = vmatprep.subr.bf16.mxu0 %v3772_v3  ;;  %v1250_v49 = vld [vmem:[#allocation3 + $0x4] sm:$0xff]  ;;  %v1251_v50 = vld [vmem:[#allocation3 + $0xc] sm:$0xff]  ;;  %v3708_v38 = vld [vmem:[%s4562_s7 + $0xb0] sm:$0xff]  }
 0x20a   : > { %v1252_v51 = vpack.c.bf16 %v1251_v50, %v1250_v49  ;;  %v3709_v39 = vld [vmem:[%s4562_s7 + $0xb8] sm:$0xff]   ;;  %v3715_v49 = vld [vmem:[%s4564_s9 + $0x50] sm:$0xff]  }
 0x20b   : > { %3383 = vmatmul.mubr.bf16.vlgmr.msra.gmra.mrb[8].mxu1 %v1035_v41  ;;  %v3716_v50 = vld [vmem:[%s4564_s9 + $0x18] sm:$0xff]  }
 0x20c   : > { %3391 = vmatpush3.bf16.msra.mxu0 %v3680_v40  ;;  %3422 = vmatprep.mubr.msk.bf16.mxu1 %vm3773_vm0, %v3772_v3 }
 0x20d   : > { %3392 = vmatprep.subr.bf16.mxu0 %v3772_v3  ;;  %3407 = vmatpush3.bf16.msra.mxu1 %v3686_v52  ;;  %v3718_v52 = vld [vmem:[%s4564_s9 + $0x20] sm:$0xff]  }
 0x20e   : > { %3408 = vmatprep.subr.bf16.mxu1 %v3772_v3 }
 0x210   : > { %3393 = vmatpush3.bf16.msra.mxu0 %v3681_v42  ;;  %v3710_v42 = vld [vmem:[%s4564_s9] sm:$0xff]  }
 0x211   : > { %3394 = vmatprep.subr.bf16.mxu0 %v3772_v3  ;;  %3409 = vmatpush3.bf16.msra.mxu1 %v3688_v54  ;;  %v3720_v54 = vld [vmem:[%s4564_s9 + $0x28] sm:$0xff]  }
 0x212   : > { %3410 = vmatprep.subr.bf16.mxu1 %v3772_v3 }
 0x214   : > { %3395 = vmatpush3.bf16.msra.mxu0 %v3682_v44  ;;  %v3711_v44 = vld [vmem:[%s4564_s9 + $0x40] sm:$0xff]  }
 0x215   : > { %3396 = vmatprep.subr.bf16.mxu0 %v3772_v3  ;;  %3411 = vmatpush3.bf16.msra.mxu1 %v3690_v56  ;;  %v3722_v56 = vld [vmem:[%s4564_s9 + $0x30] sm:$0xff]  }
 0x216   : > { %3412 = vmatprep.subr.bf16.mxu1 %v3772_v3 }
 0x218   : > { %3397 = vmatpush3.bf16.msra.mxu0 %v3683_v46  ;;  %v3712_v46 = vld [vmem:[%s4564_s9 + $0x8] sm:$0xff]  }
 0x219   : > { %3398 = vmatprep.subr.bf16.mxu0 %v3772_v3  ;;  %3413 = vmatpush3.bf16.msra.mxu1 %v3692_v58  ;;  %v3724_v58 = vld [vmem:[%s4564_s9 + $0x38] sm:$0xff]  }
 0x21a   : > { %3414 = vmatprep.subr.bf16.mxu1 %v3772_v3 }
 0x21c   : > { %3399 = vmatpush3.bf16.msra.mxu0 %v3684_v47  ;;  %v3713_v47 = vld [vmem:[%s4564_s9 + $0x48] sm:$0xff]  }
 0x21d   : > { %3400 = vmatprep.subr.bf16.mxu0 %v3772_v3  ;;  %3415 = vmatpush3.bf16.msra.mxu1 %v3694_v59  ;;  %v3725_v59 = vld [vmem:[%s4564_s9 + $0x78] sm:$0xff]  }
 0x21e   : > { %3416 = vmatprep.subr.bf16.mxu1 %v3772_v3 }
 0x220   : > { %3401 = vmatpush3.bf16.msra.mxu0 %v3685_v48  ;;  %v3714_v48 = vld [vmem:[%s4564_s9 + $0x10] sm:$0xff]  }
 0x221   : > { %3426 = vmatprep.subr.bf16.mxu0 %v3772_v3  ;;  %3417 = vmatpush3.bf16.msra.mxu1 %v3696_v60 }
 0x222   : > { %3418 = vmatprep.subr.bf16.mxu1 %v3772_v3 }
 0x223   : > { %3403 = vmatmul.mubr.bf16.vlgmr.msra.gmra.mrb[12].mxu0 %v1252_v51  ;;  %v3717_v51 = vld [vmem:[%s4564_s9 + $0x58] sm:$0xff]  }
 0x224   : > { %3442 = vmatprep.mubr.msk.bf16.mxu0 %vm3773_vm0, %v3772_v3  ;;  %3427 = vmatpush3.bf16.msra.mxu0 %v3687_v53  ;;  %v3719_v53 = vld [vmem:[%s4564_s9 + $0x60] sm:$0xff]  }
 0x225   : > { %3428 = vmatprep.subr.bf16.mxu0 %v3772_v3  ;;  %3419 = vmatpush3.bf16.msra.mxu1 %v3698_v62 }
 0x226   : > { %3420 = vmatprep.subr.bf16.mxu1 %v3772_v3 }
 0x228   : > { %3429 = vmatpush3.bf16.msra.mxu0 %v3689_v55  ;;  %v3721_v55 = vld [vmem:[%s4564_s9 + $0x68] sm:$0xff]  }
 0x229   : > { %3430 = vmatprep.subr.bf16.mxu0 %v3772_v3  ;;  %3421 = vmatpush3.bf16.msra.mxu1 %v3700_v0 }
 0x22a   : > { %3446 = vmatprep.subr.bf16.mxu1 %v3772_v3 }
 0x22c   : > { %3431 = vmatpush3.bf16.msra.mxu0 %v3691_v57  ;;  %v3723_v57 = vld [vmem:[%s4564_s9 + $0x70] sm:$0xff]  }
 0x22d   : > { %3432 = vmatprep.subr.bf16.mxu0 %v3772_v3 }
 0x230   : > { %3433 = vmatpush3.bf16.msra.mxu0 %v3693_v61 }
 0x231   : > { %3434 = vmatprep.subr.bf16.mxu0 %v3772_v3 }
 0x234   : > { %3435 = vmatpush3.bf16.msra.mxu0 %v3695_v63 }
 0x235   : > { %3436 = vmatprep.subr.bf16.mxu0 %v3772_v3 }
 0x238   : > { %3437 = vmatpush3.bf16.msra.mxu0 %v3697_v1 }
 0x239   : > { %3438 = vmatprep.subr.bf16.mxu0 %v3772_v3 }
 0x23c   : > { %3439 = vmatpush3.bf16.msra.mxu0 %v3699_v2 }
 0x23d   : > { %3440 = vmatprep.subr.bf16.mxu0 %v3772_v3 }
 0x240   : > { %3441 = vmatpush3.bf16.msra.mxu0 %v3701_v4 }
 0x241   : > { %3466 = vmatprep.subr.bf16.mxu0 %v3772_v3 }
 0x2d6   : > { %v1154_v5 = vpop.f32.mrb[8].mxu0 }
 0x2d7   : > { %v3364_v6 = vpop.f32.mrb[9].mxu0 }
 0x2d8   : > { %v1157_v7 = vpop.f32.mrb[10].mxu0 }
 0x2d9   : > { %v3365_v8 = vpop.f32.mrb[11].mxu0 }
 0x2da   : > { %v3009_v8 = vld [vmem:[%s4563_s8] ss:$0 sm:$0xff] }
 0x2de   : > { %v1243_v9 = vpop.f32.mrb[8].mxu1 }
 0x2df   : > { %v1244_v10 = vadd.f32 %v1243_v9, %v1154_v5  ;;  %v3384_v11 = vpop.f32.mrb[9].mxu1 }
 0x2e0   : > { %v1246_v12 = vpop.f32.mrb[10].mxu1 }
 0x2e1   : > { %v1247_v13 = vadd.f32 %v1246_v12, %v1157_v7  ;;  %v3385_v14 = vpop.f32.mrb[11].mxu1 }
 0x2f6   : > { %v1352_v15 = vpop.f32.mrb[12].mxu0 }
 0x2f7   : > { %v1359_v17 = vadd.f32 %v1352_v15, %v1244_v10  ;;  %v3404_v18 = vpop.f32.mrb[13].mxu0 }
 0x2f8   : > { %v1355_v19 = vpop.f32.mrb[14].mxu0 }
 0x2f9   : > { %v1368_v20 = vadd.f32 %v2952_v16, %v1359_v17  ;;  %v1360_v21 = vadd.f32 %v1355_v19, %v1247_v13  ;;  %v3405_v22 = vpop.f32.mrb[15].mxu0 }
 0x2fa   : > { %v3726_v22 = vld [vmem:[%s4564_s9 + $0x80] sm:$0xff]  }
 0x2fb   : > { %v4230_v23 = vmax.f32 %v1368_v20, 0.0  ;;  %v1369_v24 = vadd.f32 %v2952_v16, %v1360_v21 }
 0x2fd   : > { %1373 = vst [vmem:[#allocation4 + $0x4] sm:$0xff] %v4230_v23  ;;  %v4233_v25 = vmax.f32 %v1369_v24, 0.0  ;;  %v2057_v15 = vadd.f32 %v4230_v23, %v4117_v32  ;;  %v3727_v32 = vld [vmem:[%s4564_s9 + $0x88] sm:$0xff]  }
 0x2ff   : > { %1374 = vst [vmem:[#allocation4 + $0xc] sm:$0xff] %v4233_v25  ;;  %v1397_v27 = vpack.c.bf16 %v4233_v25, %v4230_v23  ;;  %v2058_v18 = vadd.f32 %v4233_v25, %v4120_v34  ;;  %v3728_v34 = vld [vmem:[%s4564_s9 + $0x90] sm:$0xff]   ;;  %v3729_v23 = vld [vmem:[%s4564_s9 + $0x98] sm:$0xff]   ;;  %v3730_v25 = vld [vmem:[%s4564_s9 + $0xa0] sm:$0xff]  }
 0x301   : > { %3423 = vmatmul.mubr.bf16.vlgmr.msra.gmra.mrb[12].mxu1 %v1397_v27  ;;  %v3731_v27 = vld [vmem:[%s4564_s9 + $0xa8] sm:$0xff]  }
 0x302   : > { %3447 = vmatpush3.bf16.msra.mxu1 %v3702_v26  ;;  %3462 = vmatprep.mubr.msk.bf16.mxu1 %vm3773_vm0, %v3772_v3 }
 0x303   : > { %3448 = vmatprep.subr.bf16.mxu1 %v3772_v3 }
 0x304   : > { %v1376_v29 = vld [vmem:[#allocation4] sm:$0xff] }
 0x306   : > { %v1377_v30 = vld [vmem:[#allocation4 + $0x8] sm:$0xff]  ;;  %3449 = vmatpush3.bf16.msra.mxu1 %v3703_v28  ;;  %v1594_v40 = vld [vmem:[#allocation4 + $0x10] sm:$0xff]  ;;  %v3732_v28 = vld [vmem:[%s4564_s9 + $0xb0] sm:$0xff]  }
 0x307   : > { %v1378_v33 = vpack.c.bf16 %v1377_v30, %v1376_v29  ;;  %3450 = vmatprep.subr.bf16.mxu1 %v3772_v3  ;;  %v1595_v41 = vpack.c.bf16 %v1594_v40, %v1377_v30  ;;  %v3733_v29 = vld [vmem:[%s4564_s9 + $0xb8] sm:$0xff]  }
 0x308   : > { %v3741_v40 = vld [vmem:[%s4566_s11 + $0x38] sm:$0xff]  }
 0x309   : > { %3443 = vmatmul.mubr.bf16.vlgmr.msra.gmra.mrb[16].mxu0 %v1378_v33  ;;  %v3735_v33 = vld [vmem:[%s4566_s11 + $0x8] sm:$0xff]  }
 0x30a   : > { %3451 = vmatpush3.bf16.msra.mxu1 %v3704_v31  ;;  %3482 = vmatprep.mubr.msk.bf16.mxu0 %vm3773_vm0, %v3772_v3  ;;  %v3734_v31 = vld [vmem:[%s4566_s11] sm:$0xff]  }
 0x30b   : > { %3452 = vmatprep.subr.bf16.mxu1 %v3772_v3  ;;  %3467 = vmatpush3.bf16.msra.mxu0 %v3711_v44 }
 0x30c   : > { %3468 = vmatprep.subr.bf16.mxu0 %v3772_v3 }
 0x30e   : > { %3453 = vmatpush3.bf16.msra.mxu1 %v3705_v35  ;;  %v3736_v35 = vld [vmem:[%s4566_s11 + $0x10] sm:$0xff]  }
 0x30f   : > { %3454 = vmatprep.subr.bf16.mxu1 %v3772_v3  ;;  %3469 = vmatpush3.bf16.msra.mxu0 %v3713_v47 }
 0x310   : > { %3470 = vmatprep.subr.bf16.mxu0 %v3772_v3 }
 0x312   : > { %3455 = vmatpush3.bf16.msra.mxu1 %v3706_v36  ;;  %v3737_v36 = vld [vmem:[%s4566_s11 + $0x18] sm:$0xff]  }
 0x313   : > { %3456 = vmatprep.subr.bf16.mxu1 %v3772_v3  ;;  %3471 = vmatpush3.bf16.msra.mxu0 %v3715_v49 }
 0x314   : > { %3472 = vmatprep.subr.bf16.mxu0 %v3772_v3 }
 0x316   : > { %3457 = vmatpush3.bf16.msra.mxu1 %v3707_v37  ;;  %v3738_v37 = vld [vmem:[%s4566_s11 + $0x20] sm:$0xff]  }
 0x317   : > { %3458 = vmatprep.subr.bf16.mxu1 %v3772_v3  ;;  %3473 = vmatpush3.bf16.msra.mxu0 %v3717_v51 }
 0x318   : > { %3474 = vmatprep.subr.bf16.mxu0 %v3772_v3 }
 0x31a   : > { %3459 = vmatpush3.bf16.msra.mxu1 %v3708_v38  ;;  %v3739_v38 = vld [vmem:[%s4566_s11 + $0x28] sm:$0xff]  }
 0x31b   : > { %3460 = vmatprep.subr.bf16.mxu1 %v3772_v3  ;;  %3475 = vmatpush3.bf16.msra.mxu0 %v3719_v53 }
 0x31c   : > { %3476 = vmatprep.subr.bf16.mxu0 %v3772_v3 }
 0x31e   : > { %3461 = vmatpush3.bf16.msra.mxu1 %v3709_v39  ;;  %v3740_v39 = vld [vmem:[%s4566_s11 + $0x30] sm:$0xff]  }
 0x31f   : > { %3486 = vmatprep.subr.bf16.mxu1 %v3772_v3  ;;  %3477 = vmatpush3.bf16.msra.mxu0 %v3721_v55 }
 0x320   : > { %3478 = vmatprep.subr.bf16.mxu0 %v3772_v3 }
 0x321   : > { %3463 = vmatmul.mubr.bf16.vlgmr.msra.gmra.mrb[16].mxu1 %v1595_v41 }
 0x322   : > { %3502 = vmatprep.mubr.msk.bf16.mxu1 %vm3773_vm0, %v3772_v3  ;;  %3487 = vmatpush3.bf16.msra.mxu1 %v3710_v42 }
 0x323   : > { %3488 = vmatprep.subr.bf16.mxu1 %v3772_v3  ;;  %3479 = vmatpush3.bf16.msra.mxu0 %v3723_v57 }
 0x324   : > { %3480 = vmatprep.subr.bf16.mxu0 %v3772_v3 }
 0x326   : > { %3489 = vmatpush3.bf16.msra.mxu1 %v3712_v46 }
 0x327   : > { %3490 = vmatprep.subr.bf16.mxu1 %v3772_v3  ;;  %3481 = vmatpush3.bf16.msra.mxu0 %v3725_v59 }
 0x328   : > { %3506 = vmatprep.subr.bf16.mxu0 %v3772_v3 }
 0x32a   : > { %3491 = vmatpush3.bf16.msra.mxu1 %v3714_v48 }
 0x32b   : > { %3492 = vmatprep.subr.bf16.mxu1 %v3772_v3 }
 0x32e   : > { %3493 = vmatpush3.bf16.msra.mxu1 %v3716_v50 }
 0x32f   : > { %3494 = vmatprep.subr.bf16.mxu1 %v3772_v3 }
 0x332   : > { %3495 = vmatpush3.bf16.msra.mxu1 %v3718_v52 }
 0x333   : > { %3496 = vmatprep.subr.bf16.mxu1 %v3772_v3 }
 0x336   : > { %3497 = vmatpush3.bf16.msra.mxu1 %v3720_v54  ;;  %v3066_v54 = vld [vmem:[%s4565_s10] ss:$0 sm:$0xff] }
 0x337   : > { %3498 = vmatprep.subr.bf16.mxu1 %v3772_v3 }
 0x33a   : > { %3499 = vmatpush3.bf16.msra.mxu1 %v3722_v56 }
 0x33b   : > { %3500 = vmatprep.subr.bf16.mxu1 %v3772_v3 }
 0x33e   : > { %3501 = vmatpush3.bf16.msra.mxu1 %v3724_v58 }
 0x33f   : > { %3526 = vmatprep.subr.bf16.mxu1 %v3772_v3 }
 0x3d4   : > { %v1497_v60 = vpop.f32.mrb[12].mxu1 }
 0x3d5   : > { %v3424_v61 = vpop.f32.mrb[13].mxu1 }
 0x3d6   : > { %v1500_v62 = vpop.f32.mrb[14].mxu1 }
 0x3d7   : > { %v3425_v63 = vpop.f32.mrb[15].mxu1 }
 0x3dc   : > { %v1586_v0 = vpop.f32.mrb[16].mxu0 }
 0x3dd   : > { %v1587_v1 = vadd.f32 %v1586_v0, %v1497_v60  ;;  %v3444_v2 = vpop.f32.mrb[17].mxu0 }
 0x3de   : > { %v1589_v4 = vpop.f32.mrb[18].mxu0 }
 0x3df   : > { %v1590_v5 = vadd.f32 %v1589_v4, %v1500_v62  ;;  %v3445_v6 = vpop.f32.mrb[19].mxu0 }
 0x3e0   : > { %v3067_v6 = vld [vmem:[%s4567_s12] ss:$0 sm:$0xff] }
 0x3f4   : > { %v1695_v7 = vpop.f32.mrb[16].mxu1 }
 0x3f5   : > { %v1702_v9 = vadd.f32 %v1695_v7, %v1587_v1  ;;  %v3464_v10 = vpop.f32.mrb[17].mxu1 }
 0x3f6   : > { %v1698_v11 = vpop.f32.mrb[18].mxu1 }
 0x3f7   : > { %v1711_v12 = vadd.f32 %v3009_v8, %v1702_v9  ;;  %v1703_v13 = vadd.f32 %v1698_v11, %v1590_v5  ;;  %v3465_v14 = vpop.f32.mrb[19].mxu1 }
 0x3f9   : > { %v1713_v16 = vmax.f32 %v1711_v12, 0.0  ;;  %v1712_v17 = vadd.f32 %v3009_v8, %v1703_v13 }
 0x3fb   : > { %v1714_v19 = vmax.f32 %v1712_v17, 0.0  ;;  %v1721_v20 = vpack.c.bf16 %v1713_v16, %v3772_v3  ;;  %v4348_v21 = vadd.f32 %v2057_v15, %v1713_v16 }
 0x3fd   : > { %3503 = vmatmul.mubr.bf16.vlgmr.msra.gmra.mrb[20].mxu1 %v1721_v20  ;;  %v1739_v24 = vpack.c.bf16 %v1714_v19, %v1713_v16  ;;  %v4353_v26 = vadd.f32 %v2058_v18, %v1714_v19  ;;  %v1937_v30 = vpack.c.bf16 %v3772_v3, %v1714_v19 }
 0x3fe   : > { %3542 = vmatprep.mubr.msk.bf16.mxu1 %vm3773_vm0, %v3772_v3  ;;  %3527 = vmatpush3.bf16.msra.mxu1 %v3734_v31  ;;  %v3743_v31 = vld [vmem:[%s4568_s13] sm:$0xff]  }
 0x3ff   : > { %3483 = vmatmul.mubr.bf16.vlgmr.msra.gmra.mrb[20].mxu0 %v1739_v24  ;;  %3528 = vmatprep.subr.bf16.mxu1 %v3772_v3 }
 0x400   : > { %3507 = vmatpush3.bf16.msra.mxu0 %v3726_v22  ;;  %3522 = vmatprep.mubr.msk.bf16.mxu0 %vm3773_vm0, %v3772_v3 }
 0x401   : > { %3508 = vmatprep.subr.bf16.mxu0 %v3772_v3 }
 0x402   : > { %3529 = vmatpush3.bf16.msra.mxu1 %v3735_v33 }
 0x403   : > { %3530 = vmatprep.subr.bf16.mxu1 %v3772_v3 }
 0x404   : > { %3509 = vmatpush3.bf16.msra.mxu0 %v3727_v32 }
 0x405   : > { %3510 = vmatprep.subr.bf16.mxu0 %v3772_v3 }
 0x406   : > { %3531 = vmatpush3.bf16.msra.mxu1 %v3736_v35 }
 0x407   : > { %3532 = vmatprep.subr.bf16.mxu1 %v3772_v3 }
 0x408   : > { %3511 = vmatpush3.bf16.msra.mxu0 %v3728_v34 }
 0x409   : > { %3512 = vmatprep.subr.bf16.mxu0 %v3772_v3 }
 0x40a   : > { %3533 = vmatpush3.bf16.msra.mxu1 %v3737_v36 }
 0x40b   : > { %3534 = vmatprep.subr.bf16.mxu1 %v3772_v3 }
 0x40c   : > { %3513 = vmatpush3.bf16.msra.mxu0 %v3729_v23 }
 0x40d   : > { %3514 = vmatprep.subr.bf16.mxu0 %v3772_v3 }
 0x40e   : > { %3535 = vmatpush3.bf16.msra.mxu1 %v3738_v37 }
 0x40f   : > { %3536 = vmatprep.subr.bf16.mxu1 %v3772_v3 }
 0x410   : > { %3515 = vmatpush3.bf16.msra.mxu0 %v3730_v25 }
 0x411   : > { %3516 = vmatprep.subr.bf16.mxu0 %v3772_v3 }
 0x412   : > { %3537 = vmatpush3.bf16.msra.mxu1 %v3739_v38  ;;  %v3744_v38 = vld [vmem:[%s4568_s13 + $0x18] sm:$0xff]  }
 0x413   : > { %3538 = vmatprep.subr.bf16.mxu1 %v3772_v3 }
 0x414   : > { %3517 = vmatpush3.bf16.msra.mxu0 %v3731_v27 }
 0x415   : > { %3518 = vmatprep.subr.bf16.mxu0 %v3772_v3 }
 0x416   : > { %3539 = vmatpush3.bf16.msra.mxu1 %v3740_v39  ;;  %v3745_v39 = vld [vmem:[%s4568_s13 + $0x8] sm:$0xff]  }
 0x417   : > { %3540 = vmatprep.subr.bf16.mxu1 %v3772_v3 }
 0x418   : > { %3519 = vmatpush3.bf16.msra.mxu0 %v3732_v28 }
 0x419   : > { %3520 = vmatprep.subr.bf16.mxu0 %v3772_v3 }
 0x41a   : > { %3541 = vmatpush3.bf16.msra.mxu1 %v3741_v40 }
 0x41b   : > { %3554 = vmatprep.subr.bf16.mxu1 %v3772_v3 }
 0x41c   : > { %3521 = vmatpush3.bf16.msra.mxu0 %v3733_v29 }
 0x41d   : > { %3546 = vmatprep.subr.bf16.mxu0 %v3772_v3 }
 0x41f   : > { %3523 = vmatmul.mubr.bf16.vlgmr.msra.gmra.mrb[24].mxu0 %v1937_v30  ;;  %v3742_v30 = vld [vmem:[%s4568_s13 + $0x10] sm:$0xff]  }
 0x420   : > { %3550 = vmatprep.mubr.msk.bf16.mxu0 %vm3773_vm0, %v3772_v3  ;;  %3547 = vmatpush3.bf16.msra.mxu0 %v3742_v30 }
 0x421   : > { %3548 = vmatprep.subr.bf16.mxu0 %v3772_v3 }
 0x424   : > { %3549 = vmatpush3.bf16.msra.mxu0 %v3744_v38 }
 0x425   : > { %3562 = vmatprep.subr.bf16.mxu0 %v3772_v3 }
 0x4d0   : > { %v1928_v41 = vpop.f32.mrb[20].mxu1 }
 0x4d1   : > { %v3504_v42 = vpop.f32.mrb[21].mxu1 }
 0x4d2   : > { %v1839_v44 = vpop.f32.mrb[20].mxu0  ;;  %v1931_v46 = vpop.f32.mrb[22].mxu1 }
 0x4d3   : > { %v1929_v47 = vadd.f32 %v1928_v41, %v1839_v44  ;;  %v3484_v48 = vpop.f32.mrb[21].mxu0  ;;  %v3505_v49 = vpop.f32.mrb[23].mxu1 }
 0x4d4   : > { %v1842_v50 = vpop.f32.mrb[22].mxu0 }
 0x4d5   : > { %v1932_v51 = vadd.f32 %v1931_v46, %v1842_v50  ;;  %v3485_v52 = vpop.f32.mrb[23].mxu0 }
 0x4f2   : > { %v2037_v53 = vpop.f32.mrb[24].mxu0 }
 0x4f3   : > { %v2044_v55 = vadd.f32 %v2037_v53, %v1929_v47  ;;  %v3524_v56 = vpop.f32.mrb[25].mxu0 }
 0x4f4   : > { %v2040_v57 = vpop.f32.mrb[26].mxu0 }
 0x4f5   : > { %v2053_v58 = vadd.f32 %v3066_v54, %v2044_v55  ;;  %v2045_v59 = vadd.f32 %v2040_v57, %v1932_v51  ;;  %v3525_v60 = vpop.f32.mrb[27].mxu0 }
 0x4f7   : > { %v2055_v61 = vmax.f32 %v2053_v58, 0.0  ;;  %v2054_v62 = vadd.f32 %v3066_v54, %v2045_v59 }
 0x4f9   : > { %v2061_v63 = vadd.f32 %v4348_v21, %v2055_v61  ;;  %v2056_v0 = vmax.f32 %v2054_v62, 0.0 }
 0x4fb   : > { %v2062_v1 = vadd.f32 %v4353_v26, %v2056_v0  ;;  %v4429_v2 = vadd.f32 %v2061_v63, %v4004_v43 }
 0x4fd   : > { %v4432_v4 = vadd.f32 %v2062_v1, %v4007_v45  ;;  %v3746_v1 = vld [vmem:[%s4568_s13 + $0x20] sm:$0xff]  }
 0x4ff   : > { %v2065_v5 = vpack.c.bf16 %v4432_v4, %v4429_v2 }
 0x501   : > { %3543 = vmatmul.mubr.bf16.vlgmr.msra.gmra.mrb[24].mxu1 %v2065_v5 }
 0x502   : > { %3558 = vmatprep.mubr.msk.bf16.mxu1 %vm3773_vm0, %v3772_v3  ;;  %3555 = vmatpush3.bf16.msra.mxu1 %v3743_v31 }
 0x503   : > { %3556 = vmatprep.subr.bf16.mxu1 %v3772_v3 }
 0x506   : > { %3557 = vmatpush3.bf16.msra.mxu1 %v3745_v39 }
 0x507   : > { %3570 = vmatprep.subr.bf16.mxu1 %v3772_v3 }
 0x5d4   : > { %v2171_v7 = vpop.f32.mrb[24].mxu1 }
 0x5d5   : > { %v2172_v8 = vadd.f32 %v3067_v6, %v2171_v7  ;;  %v3544_v9 = vpop.f32.mrb[25].mxu1 }
 0x5d6   : > { %v2174_v10 = vpop.f32.mrb[26].mxu1 }
 0x5d7   : > { %v4441_v43 = vmax.f32 %v2172_v8, 0.0  ;;  %v2175_v11 = vadd.f32 %v3067_v6, %v2174_v10  ;;  %v3545_v45 = vpop.f32.mrb[27].mxu1  ;;  %v3747_v10 = vld [vmem:[%s4568_s13 + $0x30] sm:$0xff]  }
 0x5d8   : > { %v3748_v45 = vld [vmem:[%s4568_s13 + $0x28] sm:$0xff]  }
 0x5d9   : > { %2192 = vrot.lane.b32.xlu1 %v4441_v43, %s3774_s24  ;;  %2182 = vrot.lane.b32.xlu0 %v4441_v43, %s3775_s25  ;;  %v4445_v12 = vmax.f32 %v2175_v11, 0.0 }
 0x5dd   : > { %2202 = vrot.lane.b32.xlu0 %v4441_v43, %s3776_s26  ;;  %2194 = vrot.lane.b32.xlu1 %v4445_v12, %s3774_s24 }
 0x5e1   : > { %2212 = vrot.lane.b32.xlu0 %v4441_v43, %s3777_s27  ;;  %2204 = vrot.lane.b32.xlu1 %v4445_v12, %s3776_s26 }
 0x5e5   : > { %2214 = vrot.lane.b32.xlu1 %v4445_v12, %s3777_s27  ;;  %2184 = vrot.lane.b32.xlu0 %v4445_v12, %s3775_s25  ;;  %s494_s27 = scalar_lea.vmem %s4570_s15, %s3124_s23 }
 0x5e9   : > { %2224 = vrot.lane.b32.xlu1 %v4445_v12, %s3778_s29  ;;  %2222 = vrot.lane.b32.xlu0 %v4441_v43, %s3778_s29 }
 0x5ed   : > { %2234 = vrot.lane.b32.xlu1 %v4445_v12, %s3779_s30  ;;  %2232 = vrot.lane.b32.xlu0 %v4441_v43, %s3779_s30 }
 0x5f1   : > { %2244 = vrot.lane.b32.xlu1 %v4445_v12, %s3780_s16  ;;  %2242 = vrot.lane.b32.xlu0 %v4441_v43, %s3780_s16 }
 0x64b   : > { %v2193_v13 = vpop.permute.xlu1 %2192  ;;  %v2183_v14 = vpop.permute.xlu0 %2182 }
 0x64c   : > { %v2188_v17 = vmax.f32 %v4441_v43, %v2183_v14  ;;  %v2190_v20 = vadd.f32 %v2183_v14, %v4441_v43 }
 0x64e   : > { %v2198_v21 = vmax.f32 %v2188_v17, %v2193_v13  ;;  %v2200_v26 = vadd.f32 %v2193_v13, %v2190_v20  ;;  %v3749_v13 = vld [vmem:[%s4568_s13 + $0x38] sm:$0xff]   ;;  %v3751_v20 = vld [vmem:[%s4568_s13 + $0x50] sm:$0xff]  }
 0x64f   : > { %v2203_v15 = vpop.permute.xlu0 %2202  ;;  %v2195_v16 = vpop.permute.xlu1 %2194 }
 0x650   : > { %v2208_v27 = vmax.f32 %v2198_v21, %v2203_v15  ;;  %v2210_v33 = vadd.f32 %v2203_v15, %v2200_v26 }
 0x653   : > { %v2213_v18 = vpop.permute.xlu0 %2212  ;;  %v2205_v19 = vpop.permute.xlu1 %2204 }
 0x654   : > { %v2218_v37 = vmax.f32 %v2208_v27, %v2213_v18  ;;  %v2220_v40 = vadd.f32 %v2213_v18, %v2210_v33  ;;  %v3750_v18 = vld [vmem:[%s4568_s13 + $0x40] sm:$0xff]  }
 0x657   : > { %v2215_v22 = vpop.permute.xlu1 %2214  ;;  %v2185_v24 = vpop.permute.xlu0 %2184 }
 0x658   : > { %v2189_v32 = vmax.f32 %v4445_v12, %v2185_v24  ;;  %v2191_v34 = vadd.f32 %v2185_v24, %v4445_v12  ;;  %v3753_v24 = vld [vmem:[%s4568_s13 + $0x58] sm:$0xff]  }
 0x65a   : > { %v2199_v23 = vmax.f32 %v2189_v32, %v2195_v16  ;;  %v2201_v25 = vadd.f32 %v2195_v16, %v2191_v34 }
 0x65b   : > { %v2225_v28 = vpop.permute.xlu1 %2224  ;;  %v2223_v29 = vpop.permute.xlu0 %2222 }
 0x65c   : > { %v2209_v35 = vmax.f32 %v2199_v23, %v2205_v19  ;;  %v2211_v36 = vadd.f32 %v2205_v19, %v2201_v25  ;;  %v2228_v44 = vmax.f32 %v2218_v37, %v2223_v29  ;;  %v2230_v50 = vadd.f32 %v2223_v29, %v2220_v40  ;;  %v3754_v25 = vld [vmem:[%s4568_s13 + $0x60] sm:$0xff]   ;;  %v3755_v29 = vld [vmem:[%s4568_s13 + $0x68] sm:$0xff]  }
 0x65e   : > { %v2219_v41 = vmax.f32 %v2209_v35, %v2215_v22  ;;  %v2221_v42 = vadd.f32 %v2215_v22, %v2211_v36  ;;  %v3752_v22 = vld [vmem:[%s4568_s13 + $0x48] sm:$0xff]  }
 0x65f   : > { %v2235_v46 = vpop.permute.xlu1 %2234  ;;  %v2233_v47 = vpop.permute.xlu0 %2232 }
 0x660   : > { %v2229_v48 = vmax.f32 %v2219_v41, %v2225_v28  ;;  %v2231_v49 = vadd.f32 %v2225_v28, %v2221_v42  ;;  %v2238_v51 = vmax.f32 %v2228_v44, %v2233_v47  ;;  %v2240_v54 = vadd.f32 %v2233_v47, %v2230_v50 }
 0x662   : > { %v2239_v52 = vmax.f32 %v2229_v48, %v2235_v46  ;;  %v2241_v53 = vadd.f32 %v2235_v46, %v2231_v49 }
 0x663   : > { %v2245_v55 = vpop.permute.xlu1 %2244  ;;  %v2243_v56 = vpop.permute.xlu0 %2242 }
 0x664   : > { %v2249_v57 = vmax.f32 %v2239_v52, %v2245_v55  ;;  %v2251_v58 = vadd.f32 %v2245_v55, %v2241_v53  ;;  %v2248_v59 = vmax.f32 %v2238_v51, %v2243_v56  ;;  %v2250_v60 = vadd.f32 %v2243_v56, %v2240_v54 }
 0x666   : > { %v2253_v61 = vmul.f32 0.125, %v2251_v58  ;;  %2258 = vst.msk [vmem:[#allocation6 + $0xb] sm:$0xff] %vm2256_vm2, %v2249_v57  ;;  %v2252_v62 = vmul.f32 0.125, %v2250_v60  ;;  %2257 = vst.msk [vmem:[#allocation6 + $0x3] sm:$0xff] %vm2256_vm2, %v2248_v59 }
 0x668   : > { %2263 = vrot.lane.b32.xlu1 %v2253_v61, %s3780_s16  ;;  %2261 = vrot.lane.b32.xlu0 %v2252_v62, %s3780_s16 }
 0x6da   : > { %v2264_v63 = vpop.permute.xlu1 %2263  ;;  %v2262_v0 = vpop.permute.xlu0 %2261 }
 0x6db   : > { %2269 = vst.msk [vmem:[#allocation6 + $0xb] sm:$0xff] %vm2267_vm3, %v2264_v63  ;;  %2268 = vst.msk [vmem:[#allocation6 + $0x3] sm:$0xff] %vm2267_vm3, %v2262_v0 }
 0x6e2   : > { %v2278_v5 = vld [vmem:[#allocation6 + $0x1] sm:$0xff]  ;;  %v2279_v6 = vld [vmem:[#allocation6 + $0x9] sm:$0xff] }
 0x6e3   : > { %v2271_v7 = vld [vmem:[#allocation6] sm:$0xff]  ;;  %v2280_v8 = vpack.c.bf16 %v2279_v6, %v2278_v5  ;;  %v2272_v9 = vld [vmem:[#allocation6 + $0x8] sm:$0xff] }
 0x6e4   : > { %v2273_v11 = vpack.c.bf16 %v2272_v9, %v2271_v7  ;;  %v2399_v14 = vld [vmem:[#allocation6 + $0x2] sm:$0xff]  ;;  %v2400_v15 = vld [vmem:[#allocation6 + $0xa] sm:$0xff] }
 0x6e5   : > { %3551 = vmatmul.mubr.msk.bf16.vlgmr.msra.gmra.mrb[28].mxu0 %vm2298_vm4, %v2280_v8  ;;  %v2465_v16 = vld [vmem:[#allocation6 + $0x3] sm:$0xff]  ;;  %v2466_v17 = vld [vmem:[#allocation6 + $0xb] sm:$0xff]  ;;  %v2401_v19 = vpack.c.bf16 %v2400_v15, %v2399_v14 }
 0x6e6   : > { %3559 = vmatmul.mubr.msk.bf16.vlgmr.msra.gmra.mrb[28].mxu1 %vm2298_vm4, %v2273_v11  ;;  %3563 = vmatpush3.bf16.msra.mxu0 %v3746_v1  ;;  %v2467_v21 = vpack.c.bf16 %v2466_v17, %v2465_v16  ;;  %v2531_v26 = vld [vmem:[#allocation6 + $0x4] sm:$0xff]  ;;  %v2532_v32 = vld [vmem:[#allocation6 + $0xc] sm:$0xff] }
 0x6e7   : > { %3571 = vmatpush3.bf16.msra.mxu1 %v3747_v10  ;;  %3564 = vmatprep.subr.bf16.mxu0 %v3772_v3  ;;  %v2597_v34 = vld [vmem:[#allocation6 + $0x5] sm:$0xff]  ;;  %v2598_v23 = vld [vmem:[#allocation6 + $0xd] sm:$0xff]  ;;  %v2533_v27 = vpack.c.bf16 %v2532_v32, %v2531_v26  ;;  %v3121_v10 = vld [vmem:[%s4569_s14] ss:$0 sm:$0xff] }
 0x6e8   : > { %3572 = vmatprep.subr.bf16.mxu1 %v3772_v3  ;;  %3566 = vmatprep.mubr.msk.bf16.mxu0 %vm3773_vm0, %v3772_v3  ;;  %v2599_v28 = vpack.c.bf16 %v2598_v23, %v2597_v34  ;;  %v2663_v30 = vld [vmem:[#allocation6 + $0x6] sm:$0xff]  ;;  %v2664_v31 = vld [vmem:[#allocation6 + $0xe] sm:$0xff] }
 0x6e9   : > { %3574 = vmatprep.mubr.msk.bf16.mxu1 %vm3773_vm0, %v3772_v3  ;;  %v2665_v33 = vpack.c.bf16 %v2664_v31, %v2663_v30 }
 0x6ea   : > { %3565 = vmatpush3.bf16.msra.mxu0 %v3748_v45 }
 0x6eb   : > { %3573 = vmatpush3.bf16.msra.mxu1 %v3749_v13  ;;  %3578 = vmatprep.subr.bf16.mxu0 %v3772_v3 }
 0x6ec   : > { %3586 = vmatprep.subr.bf16.mxu1 %v3772_v3 }
 0x6ed   : > { %3567 = vmatmul.mubr.msk.bf16.vlgmr.msra.gmra.mrb[32].mxu0 %vm2298_vm4, %v2401_v19 }
 0x6ee   : > { %3575 = vmatmul.mubr.msk.bf16.vlgmr.msra.gmra.mrb[32].mxu1 %vm2298_vm4, %v2467_v21  ;;  %3579 = vmatpush3.bf16.msra.mxu0 %v3750_v18 }
 0x6ef   : > { %3587 = vmatpush3.bf16.msra.mxu1 %v3751_v20  ;;  %3580 = vmatprep.subr.bf16.mxu0 %v3772_v3 }
 0x6f0   : > { %3588 = vmatprep.subr.bf16.mxu1 %v3772_v3  ;;  %3582 = vmatprep.mubr.msk.bf16.mxu0 %vm3773_vm0, %v3772_v3 }
 0x6f1   : > { %3590 = vmatprep.mubr.msk.bf16.mxu1 %vm3773_vm0, %v3772_v3 }
 0x6f2   : > { %3581 = vmatpush3.bf16.msra.mxu0 %v3752_v22 }
 0x6f3   : > { %3589 = vmatpush3.bf16.msra.mxu1 %v3753_v24  ;;  %3594 = vmatprep.subr.bf16.mxu0 %v3772_v3 }
 0x6f5   : > { %3583 = vmatmul.mubr.msk.bf16.vlgmr.msra.gmra.mrb[36].mxu0 %vm2298_vm4, %v2533_v27 }
 0x6f6   : > { %3591 = vmatmul.mubr.msk.bf16.vlgmr.msra.gmra.mrb[36].mxu1 %vm2298_vm4, %v2599_v28  ;;  %3595 = vmatpush3.bf16.msra.mxu0 %v3754_v25 }
 0x6f7   : > { %3596 = vmatprep.subr.bf16.mxu0 %v3772_v3  ;;  %3598 = vmatprep.mubr.msk.bf16.mxu0 %vm3773_vm0, %v3772_v3 }
 0x6fa   : > { %3597 = vmatpush3.bf16.msra.mxu0 %v3755_v29 }
 0x6fd   : > { %3599 = vmatmul.mubr.msk.bf16.vlgmr.msra.gmra.mrb[40].mxu0 %vm2298_vm4, %v2665_v33 }
 0x7b8   : > { %v2336_v35 = vpop.f32.mrb[28].mxu0 }
 0x7b9   : > { %v2392_v36 = vpop.f32.mrb[28].mxu1  ;;  %v3552_v37 = vpop.f32.mrb[29].mxu0 }
 0x7ba   : > { %v2393_v38 = vadd.f32 %v2392_v36, %v2336_v35  ;;  %v3560_v39 = vpop.f32.mrb[29].mxu1  ;;  %v2339_v40 = vpop.f32.mrb[30].mxu0 }
 0x7bb   : > { %v2395_v41 = vpop.f32.mrb[30].mxu1  ;;  %v3553_v42 = vpop.f32.mrb[31].mxu0 }
 0x7bc   : > { %v2396_v44 = vadd.f32 %v2395_v41, %v2339_v40  ;;  %v3561_v46 = vpop.f32.mrb[31].mxu1 }
 0x7c0   : > { %v2456_v47 = vpop.f32.mrb[32].mxu0 }
 0x7c1   : > { %v2463_v48 = vadd.f32 %v2456_v47, %v2393_v38  ;;  %v2522_v49 = vpop.f32.mrb[32].mxu1  ;;  %v3568_v3 = vpop.f32.mrb[33].mxu0 }
 0x7c2   : > { %v3576_v50 = vpop.f32.mrb[33].mxu1  ;;  %v2459_v51 = vpop.f32.mrb[34].mxu0 }
 0x7c3   : > { %v2529_v52 = vadd.f32 %v2522_v49, %v2463_v48  ;;  %v2464_v53 = vadd.f32 %v2459_v51, %v2396_v44  ;;  %v2525_v54 = vpop.f32.mrb[34].mxu1  ;;  %v3569_v55 = vpop.f32.mrb[35].mxu0 }
 0x7c4   : > { %v3577_v56 = vpop.f32.mrb[35].mxu1 }
 0x7c5   : > { %v2530_v57 = vadd.f32 %v2525_v54, %v2464_v53 }
 0x7c8   : > { %v2588_v58 = vpop.f32.mrb[36].mxu0 }
 0x7c9   : > { %v2595_v59 = vadd.f32 %v2588_v58, %v2529_v52  ;;  %v2654_v60 = vpop.f32.mrb[36].mxu1  ;;  %v3584_v61 = vpop.f32.mrb[37].mxu0 }
 0x7ca   : > { %v3592_v62 = vpop.f32.mrb[37].mxu1  ;;  %v2591_v63 = vpop.f32.mrb[38].mxu0 }
 0x7cb   : > { %v2661_v0 = vadd.f32 %v2654_v60, %v2595_v59  ;;  %v2596_v1 = vadd.f32 %v2591_v63, %v2530_v57  ;;  %v2657_v5 = vpop.f32.mrb[38].mxu1  ;;  %v3585_v6 = vpop.f32.mrb[39].mxu0 }
 0x7cc   : > { %v3593_v7 = vpop.f32.mrb[39].mxu1 }
 0x7cd   : > { %v2662_v8 = vadd.f32 %v2657_v5, %v2596_v1 }
 0x7d0   : > { %v2720_v9 = vpop.f32.mrb[40].mxu0 }
 0x7d1   : > { %v2727_v11 = vadd.f32 %v2720_v9, %v2661_v0  ;;  %v3600_v45 = vpop.f32.mrb[41].mxu0 }
 0x7d2   : > { %v2723_v13 = vpop.f32.mrb[42].mxu0 }
 0x7d3   : > { %v2736_v14 = vadd.f32 %v3121_v10, %v2727_v11  ;;  %v2728_v15 = vadd.f32 %v2723_v13, %v2662_v8  ;;  %v3601_v16 = vpop.f32.mrb[43].mxu0 }
 0x7d5   : > { %v2738_v17 = vsub.f32 0.0, %v2736_v14  ;;  %v2737_v18 = vadd.f32 %v3121_v10, %v2728_v15 }
 0x7d7   : > { %v2740_v19 = vmul.f32 1.442695, %v2738_v17  ;;  %v2739_v20 = vsub.f32 0.0, %v2737_v18 }
 0x7d9   : > { %3756 = vpow2.f32 %v2740_v19  ;;  %v2742_v21 = vmul.f32 1.442695, %v2739_v20 }
 0x7db   : > { %3758 = vpow2.f32 %v2742_v21 }
 0x7e3   : > { %v3757_v22 = vpop.eup %3756 }
 0x7e4   : > { %v2744_v24 = vadd.f32 1.0, %v3757_v22 }
 0x7e5   : > { %v3759_v26 = vpop.eup %3758 }
 0x7e6   : > { %3760 = vrcp.f32 %v2744_v24  ;;  %v2745_v32 = vadd.f32 1.0, %v3759_v26 }
 0x7e8   : > { %3762 = vrcp.f32 %v2745_v32 }
 0x7f0   : > { %v3761_v34 = vpop.eup %3760 }
 0x7f1   : > { %v2750_v23 = vmul.f32 %v3761_v34, %v4441_v43 }
 0x7f2   : > { %v3763_v25 = vpop.eup %3762 }
 0x7f3   : > { %v2752_v27 = vadd.f32 %v2750_v23, %v4429_v2  ;;  %v2751_v28 = vmul.f32 %v3763_v25, %v4445_v12 }
 0x7f5   : > { %2754 = vst [vmem:[%s494_s27] sm:$0xff] %v2752_v27  ;;  %v2753_v29 = vadd.f32 %v2751_v28, %v4432_v4 }
 0x7f7   : > { %2755 = vst [vmem:[%s494_s27 + $0x8] sm:$0xff] %v2753_v29 }
 0x7f8 PF: > { %s25_s18 = sadd.s32 1, %s3770_s18  }
 0x7f9   : > { %p22_p4 = scmp.ge.s32.totalorder %s25_s18, 4  }
 0x7fb   :  { %24 = sbr.rel (!%p22_p4) target bundleno = 1 (0x1), region = 124 }

</bundles_post_ra>
